<compile_context>
chip_gen: v7x
topology: tpu7x:2x2x1
jax: 0.10.0
libtpu: 0.0.40
codegen_flags: <defaults>
</compile_context>

<pallas_src>
import functools
import math

import jax
import jax.numpy as jnp
import numpy as np
from jax import lax
from jax.experimental import pallas as pl
from jax.experimental.pallas import tpu as pltpu

LANES = 128  # f32 lane width; packed parameter slab and output use this


def lstm_policy_kernel(param_ref, seq_ref, eps_ref, gt_ref, out_ref, *,
                       H, M, A, off_wih, off_whh, off_w1, off_w2, off_w3, off_b):
    T, Bb, D = seq_ref.shape
    four_h = 4 * H
    L = out_ref.shape[-1]                                        # 128

    # ---- parameters: one packed (rows, 128) slab, static row/lane slices ----
    # LSTM weights are pre-reordered to gate order [i, f, o, g] and the i/f/o
    # (sigmoid) columns pre-scaled by 0.5 so one tanh covers all gates.
    wih = param_ref[pl.ds(off_wih, D), pl.ds(0, four_h)]         # (D, 4H)
    whh = param_ref[pl.ds(off_whh, H), pl.ds(0, four_h)]         # (H, 4H)
    w1 = param_ref[pl.ds(off_w1, H), pl.ds(0, M)]                # (H, M)
    w2 = param_ref[pl.ds(off_w2, M), pl.ds(0, M)]                # (M, M)
    w3 = param_ref[pl.ds(off_w3, M), :]                          # (M, 128), zero-padded
    b_lstm = param_ref[pl.ds(off_b + 0, 1), pl.ds(0, four_h)]    # (1, 4H)
    b1 = param_ref[pl.ds(off_b + 1, 1), pl.ds(0, M)]             # (1, M)
    b2 = param_ref[pl.ds(off_b + 2, 1), pl.ds(0, M)]             # (1, M)
    b3 = param_ref[pl.ds(off_b + 3, 1), :]                       # (1, 128), zero-padded
    log_std = param_ref[pl.ds(off_b + 4, 1), pl.ds(0, A)]        # (1, A)

    # ---- hoisted input projection: one (T*Bb, D)@(D, 4H) MXU matmul + bias ----
    x2 = seq_ref[...].reshape(T * Bb, D)          # time-major rows: r = t*Bb + b
    xw = jnp.dot(x2, wih, preferred_element_type=jnp.float32) + b_lstm   # (T*Bb, 4H)

    # sigmoid(x) = 0.5*tanh(0.5*x) + 0.5; the 0.5*x is baked into the weights.
    # Hoisted per-lane affine: lanes [0,3H) are sigmoid gates, [3H,4H) stays tanh.
    lane4h = lax.broadcasted_iota(jnp.int32, (1, four_h), 1)
    is_sig = lane4h < 3 * H
    act_scale = jnp.where(is_sig, jnp.float32(0.5), jnp.float32(1.0))
    act_shift = jnp.where(is_sig, jnp.float32(0.5), jnp.float32(0.0))

    # ---- LSTM recurrence: Bb sequences stepped together ----
    # TODO(synk): for large T switch to lax.fori_loop(..., unroll=2-4) + a VMEM
    # scratch for hs to bound live ranges; at T=8 full unroll is best.
    # TODO(synk): confirm in the bundle that Mosaic hoists the loop-invariant
    # whh weight push out of the unrolled loop (else pltpu.matmul_push_rhs/...).
    h = jnp.zeros((Bb, H), jnp.float32)
    c = jnp.zeros((Bb, H), jnp.float32)
    hs = []
    for t in range(T):                                           # small static T
        gates = xw[t * Bb:(t + 1) * Bb, :] + jnp.dot(
            h, whh, preferred_element_type=jnp.float32)          # (Bb, 4H)
        act = jnp.tanh(gates) * act_scale + act_shift            # one EUP push
        i_g = act[:, 0:H]
        f_g = act[:, H:2 * H]
        o_g = act[:, 2 * H:3 * H]
        g_g = act[:, 3 * H:four_h]
        c = f_g * c + i_g * g_g
        h = o_g * jnp.tanh(c)                                    # second EUP push
        hs.append(h)
    hs2 = jnp.concatenate(hs, axis=0)             # (T*Bb, H), no VMEM scratch

    # ---- Gaussian policy MLP head: Linear->tanh->Linear->tanh->Linear ----
    x = jnp.tanh(jnp.dot(hs2, w1, preferred_element_type=jnp.float32) + b1)
    x = jnp.tanh(jnp.dot(x, w2, preferred_element_type=jnp.float32) + b2)
    # w3/b3 are zero-padded to 128 lanes -> mu is lane-dense; pad lanes are exactly 0.
    mu = jnp.dot(x, w3, preferred_element_type=jnp.float32) + b3  # (T*Bb, 128)
    # TODO(synk): optionally cast projection/MLP operands to bf16 (f32 accumulate)
    # if the accuracy budget allows; kept f32 here to preserve 1e-4 parity.

    # ---- Normal(mu, exp(log_std)): sample + log_prob (A-lane-wide math) ----
    std = jnp.exp(log_std)                                       # (1, A)
    inv_std = jnp.exp(-log_std)                                  # multiply, not divide
    mu_a = mu[:, 0:A].reshape(T, Bb, A)
    eps = eps_ref[...]                                           # (T, Bb, A)
    gt = gt_ref[...]                                             # (T, Bb, A)

    pi = mu_a + std * eps
    half_log2pi = jnp.float32(0.5 * math.log(2.0 * math.pi))
    # log N(x|mu,std) = -0.5*((x-mu)/std)^2 - log_std - 0.5*log(2*pi); (pi-mu)/std == eps.
    logp_pi = jnp.sum(-0.5 * eps * eps - log_std - half_log2pi,
                      axis=-1, keepdims=True)                    # (T, Bb, 1)
    z = (gt - mu_a) * inv_std
    logp = jnp.sum(-0.5 * z * z - log_std - half_log2pi,
                   axis=-1, keepdims=True)                       # (T, Bb, 1)

    # ---- lane-dense (T, Bb, 128) output block: [ pi | logp | logp_pi | zeros ] ----
    out_ref[...] = jnp.zeros((T, Bb, L), jnp.float32)
    out_ref[:, :, pl.ds(0, A)] = pi
    out_ref[:, :, pl.ds(A, 1)] = logp
    out_ref[:, :, pl.ds(A + 1, 1)] = logp_pi


def prepare_params(params):
    """One-time packing of all static parameters into a single (rows, 128) slab.

    Gate reordering (PyTorch i,f,g,o -> i,f,o,g), the 0.5 sigmoid pre-scale,
    zero-padding and concatenation all happen here so per-call code only
    touches seq/eps/gt.
    """
    D = params["wih"].shape[0]
    H = params["whh"].shape[0]
    M = params["w1"].shape[1]
    A = params["w3"].shape[1]
    four_h = 4 * H
    assert four_h <= LANES and M <= LANES and A + 2 <= LANES

    def reorder_scale(w):
        i, f, g, o = jnp.split(jnp.asarray(w, jnp.float32), 4, axis=-1)
        return jnp.concatenate([0.5 * i, 0.5 * f, 0.5 * o, g], axis=-1)

    def pad_lanes(x):
        x = jnp.asarray(x, jnp.float32)
        return jnp.pad(x, ((0, 0), (0, LANES - x.shape[1])))

    bias_block = jnp.concatenate([
        pad_lanes(reorder_scale(params["b_lstm"])),
        pad_lanes(params["b1"]),
        pad_lanes(params["b2"]),
        pad_lanes(params["b3"]),
        pad_lanes(params["log_std"]),
    ], axis=0)                                                   # (5, 128)

    parts = [
        ("off_wih", pad_lanes(reorder_scale(params["wih"]))),    # (D, 128)
        ("off_whh", pad_lanes(reorder_scale(params["whh"]))),    # (H, 128)
        ("off_w1", pad_lanes(params["w1"])),                     # (H, 128)
        ("off_w2", pad_lanes(params["w2"])),                     # (M, 128)
        ("off_w3", pad_lanes(params["w3"])),                     # (M, 128)
        ("off_b", bias_block),                                   # (5, 128)
    ]
    rows, offs, off = [], {}, 0
    for name, block in parts:
        offs[name] = off
        r = block.shape[0]
        rpad = (-r) % 8                    # keep every section sublane-aligned
        if rpad:
            block = jnp.pad(block, ((0, rpad), (0, 0)))
        rows.append(block)
        off += r + rpad
    slab = jnp.concatenate(rows, axis=0)   # (rows, 128), rows % 8 == 0

    return dict(slab=slab, D=D, H=H, M=M, A=A, **offs)


def lstm_encoder_policy_batched(seqs, eps, gt, prep, *, block_b=8):
    """Forward pass for B independent sequences in one pallas_call.

    seqs: (B, T, D); eps, gt: (B, T, A).
    Returns pi (B, T, A), logp (B, T), logp_pi (B, T) — per-sequence semantics
    identical to the PyTorch module.
    """
    B, T, D = seqs.shape
    A = prep["A"]
    assert eps.shape == (B, T, A) and gt.shape == (B, T, A)

    if B <= block_b:
        b_blk, b_pad = B, B
    else:
        assert block_b % 8 == 0, "batch block must be a sublane multiple when tiling"
        b_blk = block_b
        b_pad = -(-B // b_blk) * b_blk
    if b_pad != B:
        pad = ((0, b_pad - B), (0, 0), (0, 0))
        seqs, eps, gt = jnp.pad(seqs, pad), jnp.pad(eps, pad), jnp.pad(gt, pad)

    # Time-major so each recurrence step reads a contiguous (b_blk, 4H) row block.
    seq_tm = jnp.transpose(seqs, (1, 0, 2)).astype(jnp.float32)   # (T, Bp, D)
    eps_tm = jnp.transpose(eps, (1, 0, 2)).astype(jnp.float32)    # (T, Bp, A)
    gt_tm = jnp.transpose(gt, (1, 0, 2)).astype(jnp.float32)      # (T, Bp, A)

    kernel = functools.partial(
        lstm_policy_kernel, H=prep["H"], M=prep["M"], A=A,
        off_wih=prep["off_wih"], off_whh=prep["off_whh"], off_w1=prep["off_w1"],
        off_w2=prep["off_w2"], off_w3=prep["off_w3"], off_b=prep["off_b"])

    out = pl.pallas_call(
        kernel,
        out_shape=jax.ShapeDtypeStruct((T, b_pad, LANES), jnp.float32),
        grid=(b_pad // b_blk,),
        in_specs=[
            pl.BlockSpec(prep["slab"].shape, lambda i: (0, 0)),   # params: resident
            pl.BlockSpec((T, b_blk, D), lambda i: (0, i, 0)),
            pl.BlockSpec((T, b_blk, A), lambda i: (0, i, 0)),
            pl.BlockSpec((T, b_blk, A), lambda i: (0, i, 0)),
        ],
        out_specs=pl.BlockSpec((T, b_blk, LANES), lambda i: (0, i, 0)),
        compiler_params=pltpu.CompilerParams(
            dimension_semantics=("parallel",)),   # 2-TC sharding on v7x
    )(prep["slab"], seq_tm, eps_tm, gt_tm)

    pi = jnp.transpose(out[:, :B, :A], (1, 0, 2))     # (B, T, A)
    logp = jnp.transpose(out[:, :B, A])               # (B, T)
    logp_pi = jnp.transpose(out[:, :B, A + 1])        # (B, T)
    return pi, logp, logp_pi


def lstm_encoder_policy(seq, eps, gt, prep):
    """Single-sequence forward matching LSTMEncoderPolicy.forward(seq, gt)."""
    pi, logp, logp_pi = lstm_encoder_policy_batched(seq[None], eps[None], gt[None], prep)
    return pi[0], logp[0], logp_pi[0]


def ref_forward(seq, params, eps, gt):
    """Pure-JAX reference mirroring the PyTorch semantics (original gate order)."""
    H = params["whh"].shape[0]

    def step(carry, x_t):
        h, c = carry
        gates = x_t @ params["wih"] + h @ params["whh"] + params["b_lstm"][0]
        i = jax.nn.sigmoid(gates[0:H])
        f = jax.nn.sigmoid(gates[H:2 * H])
        g = jnp.tanh(gates[2 * H:3 * H])
        o = jax.nn.sigmoid(gates[3 * H:4 * H])
        c = f * c + i * g
        h = o * jnp.tanh(c)
        return (h, c), h

    (_, _), hs = lax.scan(step, (jnp.zeros(H), jnp.zeros(H)), seq)
    x = jnp.tanh(hs @ params["w1"] + params["b1"][0])
    x = jnp.tanh(x @ params["w2"] + params["b2"][0])
    mu = x @ params["w3"] + params["b3"][0]
    log_std = params["log_std"][0]
    std = jnp.exp(log_std)
    pi = mu + std * eps
    hl = 0.5 * math.log(2.0 * math.pi)
    logp_pi = jnp.sum(-0.5 * eps ** 2 - log_std - hl, axis=-1)
    z = (gt - mu) / std
    logp = jnp.sum(-0.5 * z ** 2 - log_std - hl, axis=-1)
    return pi, logp, logp_pi


if __name__ == "__main__":
    # Small shapes consistent with the module: seq len 8, input 16, hidden 32, action 4.
    T, D, H, A = 8, 16, 32, 4
    B = 16            # batched sequences per call -> grid of 2 "parallel" blocks of 8

    key = jax.random.PRNGKey(0)
    ks = jax.random.split(key, 9)
    scale = 0.1
    params = {
        # nn.LSTM parameters (W_ih^T, W_hh^T, b_ih + b_hh combined), PyTorch gate order.
        "wih": scale * jax.random.normal(ks[0], (D, 4 * H), jnp.float32),
        "whh": scale * jax.random.normal(ks[1], (H, 4 * H), jnp.float32),
        "b_lstm": scale * jax.random.normal(ks[2], (1, 4 * H), jnp.float32),
        # MLP [H, 32, 32, A]; biases zero-initialized (nn.init.zeros_)
        "w1": scale * jax.random.normal(ks[3], (H, 32), jnp.float32),
        "b1": jnp.zeros((1, 32), jnp.float32),
        "w2": scale * jax.random.normal(ks[4], (32, 32), jnp.float32),
        "b2": jnp.zeros((1, 32), jnp.float32),
        "w3": scale * jax.random.normal(ks[5], (32, A), jnp.float32),
        "b3": jnp.zeros((1, A), jnp.float32),
        # GaussianPolicy log_std = -0.5 * ones(action_dim)
        "log_std": -0.5 * jnp.ones((1, A), jnp.float32),
    }

    prep = prepare_params(params)   # one-time; per-call code only touches seq/eps/gt

    seqs = jax.random.normal(ks[6], (B, T, D), jnp.float32)
    eps = jax.random.normal(ks[7], (B, T, A), jnp.float32)   # Normal.sample() noise
    gt = jax.random.normal(ks[8], (B, T, A), jnp.float32)    # ground-truth actions

    fwd = jax.jit(functools.partial(lstm_encoder_policy_batched, prep=prep, block_b=8))
    pi, logp, logp_pi = fwd(seqs, eps, gt)
    jax.block_until_ready((pi, logp, logp_pi))

    # Batched reference (vmapped pure-JAX single-sequence model).
    pi_r, logp_r, logp_pi_r = jax.vmap(
        lambda s, e, g: ref_forward(s, params, e, g))(seqs, eps, gt)
    np.testing.assert_allclose(np.asarray(pi), np.asarray(pi_r), rtol=1e-4, atol=1e-4)
    np.testing.assert_allclose(np.asarray(logp), np.asarray(logp_r), rtol=1e-4, atol=1e-4)
    np.testing.assert_allclose(np.asarray(logp_pi), np.asarray(logp_pi_r), rtol=1e-4, atol=1e-4)

    # Single-sequence API (B=1 path), matching the module's forward signature.
    pi1, logp1, logp_pi1 = lstm_encoder_policy(seqs[0], eps[0], gt[0], prep)
    jax.block_until_ready((pi1, logp1, logp_pi1))
    np.testing.assert_allclose(np.asarray(pi1), np.asarray(pi_r[0]), rtol=1e-4, atol=1e-4)
    np.testing.assert_allclose(np.asarray(logp1), np.asarray(logp_r[0]), rtol=1e-4, atol=1e-4)
    np.testing.assert_allclose(np.asarray(logp_pi1), np.asarray(logp_pi_r[0]), rtol=1e-4, atol=1e-4)

    print("KERNEL_OK")
</pallas_src>

<mosaic_0001>
module attributes {stable_mosaic.version = 11 : i64} {
  func.func @lstm_policy_kernel(%arg0: i32, %arg1: memref<152x128xf32, #tpu.memory_space<vmem>>, %arg2: memref<8x8x16xf32, #tpu.memory_space<vmem>>, %arg3: memref<8x8x4xf32, #tpu.memory_space<vmem>>, %arg4: memref<8x8x4xf32, #tpu.memory_space<vmem>>, %arg5: memref<8x8x128xf32, #tpu.memory_space<vmem>>) attributes {dimension_semantics = [#tpu.dimension_semantics<parallel>], iteration_bounds = array<i64: 2>, scalar_prefetch = 0 : i64, scratch_operands = 0 : i64, tpu.core_type = #tpu.core_type<tc>, window_params = [{pipeline_mode = #tpu.pipeline_mode<synchronous>, transform_indices = @transform_0, window_bounds = array<i64: 152, 128>}, {transform_indices = @transform_1, window_bounds = array<i64: 8, 8, 16>}, {transform_indices = @transform_2, window_bounds = array<i64: 8, 8, 4>}, {transform_indices = @transform_3, window_bounds = array<i64: 8, 8, 4>}, {transform_indices = @transform_4, window_bounds = array<i64: 8, 8, 128>}]} {
    %c0 = arith.constant 0 : index
    %c0_0 = arith.constant 0 : index
    %0 = vector.load %arg1[%c0, %c0_0] : memref<152x128xf32, #tpu.memory_space<vmem>>, vector<16x128xf32>
    %c16 = arith.constant 16 : index
    %c0_1 = arith.constant 0 : index
    %1 = vector.load %arg1[%c16, %c0_1] : memref<152x128xf32, #tpu.memory_space<vmem>>, vector<32x128xf32>
    %c48 = arith.constant 48 : index
    %c0_2 = arith.constant 0 : index
    %2 = vector.load %arg1[%c48, %c0_2] : memref<152x128xf32, #tpu.memory_space<vmem>>, vector<32x32xf32>
    %c80 = arith.constant 80 : index
    %c0_3 = arith.constant 0 : index
    %3 = vector.load %arg1[%c80, %c0_3] : memref<152x128xf32, #tpu.memory_space<vmem>>, vector<32x32xf32>
    %c112 = arith.constant 112 : index
    %c0_4 = arith.constant 0 : index
    %4 = vector.load %arg1[%c112, %c0_4] : memref<152x128xf32, #tpu.memory_space<vmem>>, vector<32x128xf32>
    %c144 = arith.constant 144 : index
    %c0_5 = arith.constant 0 : index
    %5 = vector.load %arg1[%c144, %c0_5] : memref<152x128xf32, #tpu.memory_space<vmem>>, vector<1x128xf32>
    %c145 = arith.constant 145 : index
    %c0_6 = arith.constant 0 : index
    %6 = vector.load %arg1[%c145, %c0_6] : memref<152x128xf32, #tpu.memory_space<vmem>>, vector<1x32xf32>
    %c146 = arith.constant 146 : index
    %c0_7 = arith.constant 0 : index
    %7 = vector.load %arg1[%c146, %c0_7] : memref<152x128xf32, #tpu.memory_space<vmem>>, vector<1x32xf32>
    %c147 = arith.constant 147 : index
    %c0_8 = arith.constant 0 : index
    %8 = vector.load %arg1[%c147, %c0_8] : memref<152x128xf32, #tpu.memory_space<vmem>>, vector<1x128xf32>
    %c148 = arith.constant 148 : index
    %c0_9 = arith.constant 0 : index
    %9 = vector.load %arg1[%c148, %c0_9] : memref<152x128xf32, #tpu.memory_space<vmem>>, vector<1x4xf32>
    %c0_10 = arith.constant 0 : index
    %c0_11 = arith.constant 0 : index
    %c0_12 = arith.constant 0 : index
    %10 = vector.load %arg2[%c0_10, %c0_11, %c0_12] : memref<8x8x16xf32, #tpu.memory_space<vmem>>, vector<8x8x16xf32>
    %11 = vector.shape_cast %10 : vector<8x8x16xf32> to vector<64x16xf32>
    %cst = arith.constant dense<0.000000e+00> : vector<64x128xf32>
    %12 = tpu.matmul %11, %0, %cst {dimension_numbers = #tpu.dot_dimension_numbers<[1], [0], [0], [1], [0, 0, 1, 1], [], []>} : vector<64x16xf32>, vector<16x128xf32>, vector<64x128xf32> -> vector<64x128xf32>
    %13 = vector.broadcast %5 : vector<1x128xf32> to vector<64x128xf32>
    %14 = arith.addf %12, %13 : vector<64x128xf32>
    %15 = tpu.iota {dimensions = array<i32: 1>} : vector<1x128xi32>
    %c96_i32 = arith.constant 96 : i32
    %16 = vector.broadcast %c96_i32 : i32 to vector<1x128xi32>
    %17 = arith.cmpi slt, %15, %16 : vector<1x128xi32>
    %cst_13 = arith.constant 5.000000e-01 : f32
    %cst_14 = arith.constant 1.000000e+00 : f32
    %18 = vector.broadcast %cst_13 : f32 to vector<1x128xf32>
    %19 = vector.broadcast %cst_14 : f32 to vector<1x128xf32>
    %20 = arith.select %17, %18, %19 : vector<1x128xi1>, vector<1x128xf32>
    %cst_15 = arith.constant 5.000000e-01 : f32
    %cst_16 = arith.constant 0.000000e+00 : f32
    %21 = vector.broadcast %cst_15 : f32 to vector<1x128xf32>
    %22 = vector.broadcast %cst_16 : f32 to vector<1x128xf32>
    %23 = arith.select %17, %21, %22 : vector<1x128xi1>, vector<1x128xf32>
    %cst_17 = arith.constant 0.000000e+00 : f32
    %24 = vector.broadcast %cst_17 : f32 to vector<8x32xf32>
    %cst_18 = arith.constant 0.000000e+00 : f32
    %25 = vector.broadcast %cst_18 : f32 to vector<8x32xf32>
    %26 = vector.extract_strided_slice %14 {offsets = [0, 0], sizes = [8, 128], strides = [1, 1]} : vector<64x128xf32> to vector<8x128xf32>
    %cst_19 = arith.constant dense<0.000000e+00> : vector<8x128xf32>
    %27 = tpu.matmul %24, %1, %cst_19 {dimension_numbers = #tpu.dot_dimension_numbers<[1], [0], [0], [1], [0, 0, 1, 1], [], []>} : vector<8x32xf32>, vector<32x128xf32>, vector<8x128xf32> -> vector<8x128xf32>
    %28 = arith.addf %26, %27 : vector<8x128xf32>
    %29 = math.tanh %28 : vector<8x128xf32>
    %30 = vector.broadcast %20 : vector<1x128xf32> to vector<8x128xf32>
    %31 = arith.mulf %29, %30 : vector<8x128xf32>
    %32 = vector.broadcast %23 : vector<1x128xf32> to vector<8x128xf32>
    %33 = arith.addf %31, %32 : vector<8x128xf32>
    %34 = vector.extract_strided_slice %33 {offsets = [0, 0], sizes = [8, 32], strides = [1, 1]} : vector<8x128xf32> to vector<8x32xf32>
    %35 = vector.extract_strided_slice %33 {offsets = [0, 32], sizes = [8, 32], strides = [1, 1]} : vector<8x128xf32> to vector<8x32xf32>
    %36 = vector.extract_strided_slice %33 {offsets = [0, 64], sizes = [8, 32], strides = [1, 1]} : vector<8x128xf32> to vector<8x32xf32>
    %37 = vector.extract_strided_slice %33 {offsets = [0, 96], sizes = [8, 32], strides = [1, 1]} : vector<8x128xf32> to vector<8x32xf32>
    %38 = arith.mulf %35, %25 : vector<8x32xf32>
    %39 = arith.mulf %34, %37 : vector<8x32xf32>
    %40 = arith.addf %38, %39 : vector<8x32xf32>
    %41 = math.tanh %40 : vector<8x32xf32>
    %42 = arith.mulf %36, %41 : vector<8x32xf32>
    %43 = vector.extract_strided_slice %14 {offsets = [8, 0], sizes = [8, 128], strides = [1, 1]} : vector<64x128xf32> to vector<8x128xf32>
    %cst_20 = arith.constant dense<0.000000e+00> : vector<8x128xf32>
    %44 = tpu.matmul %42, %1, %cst_20 {dimension_numbers = #tpu.dot_dimension_numbers<[1], [0], [0], [1], [0, 0, 1, 1], [], []>} : vector<8x32xf32>, vector<32x128xf32>, vector<8x128xf32> -> vector<8x128xf32>
    %45 = arith.addf %43, %44 : vector<8x128xf32>
    %46 = math.tanh %45 : vector<8x128xf32>
    %47 = vector.broadcast %20 : vector<1x128xf32> to vector<8x128xf32>
    %48 = arith.mulf %46, %47 : vector<8x128xf32>
    %49 = vector.broadcast %23 : vector<1x128xf32> to vector<8x128xf32>
    %50 = arith.addf %48, %49 : vector<8x128xf32>
    %51 = vector.extract_strided_slice %50 {offsets = [0, 0], sizes = [8, 32], strides = [1, 1]} : vector<8x128xf32> to vector<8x32xf32>
    %52 = vector.extract_strided_slice %50 {offsets = [0, 32], sizes = [8, 32], strides = [1, 1]} : vector<8x128xf32> to vector<8x32xf32>
    %53 = vector.extract_strided_slice %50 {offsets = [0, 64], sizes = [8, 32], strides = [1, 1]} : vector<8x128xf32> to vector<8x32xf32>
    %54 = vector.extract_strided_slice %50 {offsets = [0, 96], sizes = [8, 32], strides = [1, 1]} : vector<8x128xf32> to vector<8x32xf32>
    %55 = arith.mulf %52, %40 : vector<8x32xf32>
    %56 = arith.mulf %51, %54 : vector<8x32xf32>
    %57 = arith.addf %55, %56 : vector<8x32xf32>
    %58 = math.tanh %57 : vector<8x32xf32>
    %59 = arith.mulf %53, %58 : vector<8x32xf32>
    %60 = vector.extract_strided_slice %14 {offsets = [16, 0], sizes = [8, 128], strides = [1, 1]} : vector<64x128xf32> to vector<8x128xf32>
    %cst_21 = arith.constant dense<0.000000e+00> : vector<8x128xf32>
    %61 = tpu.matmul %59, %1, %cst_21 {dimension_numbers = #tpu.dot_dimension_numbers<[1], [0], [0], [1], [0, 0, 1, 1], [], []>} : vector<8x32xf32>, vector<32x128xf32>, vector<8x128xf32> -> vector<8x128xf32>
    %62 = arith.addf %60, %61 : vector<8x128xf32>
    %63 = math.tanh %62 : vector<8x128xf32>
    %64 = vector.broadcast %20 : vector<1x128xf32> to vector<8x128xf32>
    %65 = arith.mulf %63, %64 : vector<8x128xf32>
    %66 = vector.broadcast %23 : vector<1x128xf32> to vector<8x128xf32>
    %67 = arith.addf %65, %66 : vector<8x128xf32>
    %68 = vector.extract_strided_slice %67 {offsets = [0, 0], sizes = [8, 32], strides = [1, 1]} : vector<8x128xf32> to vector<8x32xf32>
    %69 = vector.extract_strided_slice %67 {offsets = [0, 32], sizes = [8, 32], strides = [1, 1]} : vector<8x128xf32> to vector<8x32xf32>
    %70 = vector.extract_strided_slice %67 {offsets = [0, 64], sizes = [8, 32], strides = [1, 1]} : vector<8x128xf32> to vector<8x32xf32>
    %71 = vector.extract_strided_slice %67 {offsets = [0, 96], sizes = [8, 32], strides = [1, 1]} : vector<8x128xf32> to vector<8x32xf32>
    %72 = arith.mulf %69, %57 : vector<8x32xf32>
    %73 = arith.mulf %68, %71 : vector<8x32xf32>
    %74 = arith.addf %72, %73 : vector<8x32xf32>
    %75 = math.tanh %74 : vector<8x32xf32>
    %76 = arith.mulf %70, %75 : vector<8x32xf32>
    %77 = vector.extract_strided_slice %14 {offsets = [24, 0], sizes = [8, 128], strides = [1, 1]} : vector<64x128xf32> to vector<8x128xf32>
    %cst_22 = arith.constant dense<0.000000e+00> : vector<8x128xf32>
    %78 = tpu.matmul %76, %1, %cst_22 {dimension_numbers = #tpu.dot_dimension_numbers<[1], [0], [0], [1], [0, 0, 1, 1], [], []>} : vector<8x32xf32>, vector<32x128xf32>, vector<8x128xf32> -> vector<8x128xf32>
    %79 = arith.addf %77, %78 : vector<8x128xf32>
    %80 = math.tanh %79 : vector<8x128xf32>
    %81 = vector.broadcast %20 : vector<1x128xf32> to vector<8x128xf32>
    %82 = arith.mulf %80, %81 : vector<8x128xf32>
    %83 = vector.broadcast %23 : vector<1x128xf32> to vector<8x128xf32>
    %84 = arith.addf %82, %83 : vector<8x128xf32>
    %85 = vector.extract_strided_slice %84 {offsets = [0, 0], sizes = [8, 32], strides = [1, 1]} : vector<8x128xf32> to vector<8x32xf32>
    %86 = vector.extract_strided_slice %84 {offsets = [0, 32], sizes = [8, 32], strides = [1, 1]} : vector<8x128xf32> to vector<8x32xf32>
    %87 = vector.extract_strided_slice %84 {offsets = [0, 64], sizes = [8, 32], strides = [1, 1]} : vector<8x128xf32> to vector<8x32xf32>
    %88 = vector.extract_strided_slice %84 {offsets = [0, 96], sizes = [8, 32], strides = [1, 1]} : vector<8x128xf32> to vector<8x32xf32>
    %89 = arith.mulf %86, %74 : vector<8x32xf32>
    %90 = arith.mulf %85, %88 : vector<8x32xf32>
    %91 = arith.addf %89, %90 : vector<8x32xf32>
    %92 = math.tanh %91 : vector<8x32xf32>
    %93 = arith.mulf %87, %92 : vector<8x32xf32>
    %94 = vector.extract_strided_slice %14 {offsets = [32, 0], sizes = [8, 128], strides = [1, 1]} : vector<64x128xf32> to vector<8x128xf32>
    %cst_23 = arith.constant dense<0.000000e+00> : vector<8x128xf32>
    %95 = tpu.matmul %93, %1, %cst_23 {dimension_numbers = #tpu.dot_dimension_numbers<[1], [0], [0], [1], [0, 0, 1, 1], [], []>} : vector<8x32xf32>, vector<32x128xf32>, vector<8x128xf32> -> vector<8x128xf32>
    %96 = arith.addf %94, %95 : vector<8x128xf32>
    %97 = math.tanh %96 : vector<8x128xf32>
    %98 = vector.broadcast %20 : vector<1x128xf32> to vector<8x128xf32>
    %99 = arith.mulf %97, %98 : vector<8x128xf32>
    %100 = vector.broadcast %23 : vector<1x128xf32> to vector<8x128xf32>
    %101 = arith.addf %99, %100 : vector<8x128xf32>
    %102 = vector.extract_strided_slice %101 {offsets = [0, 0], sizes = [8, 32], strides = [1, 1]} : vector<8x128xf32> to vector<8x32xf32>
    %103 = vector.extract_strided_slice %101 {offsets = [0, 32], sizes = [8, 32], strides = [1, 1]} : vector<8x128xf32> to vector<8x32xf32>
    %104 = vector.extract_strided_slice %101 {offsets = [0, 64], sizes = [8, 32], strides = [1, 1]} : vector<8x128xf32> to vector<8x32xf32>
    %105 = vector.extract_strided_slice %101 {offsets = [0, 96], sizes = [8, 32], strides = [1, 1]} : vector<8x128xf32> to vector<8x32xf32>
    %106 = arith.mulf %103, %91 : vector<8x32xf32>
    %107 = arith.mulf %102, %105 : vector<8x32xf32>
    %108 = arith.addf %106, %107 : vector<8x32xf32>
    %109 = math.tanh %108 : vector<8x32xf32>
    %110 = arith.mulf %104, %109 : vector<8x32xf32>
    %111 = vector.extract_strided_slice %14 {offsets = [40, 0], sizes = [8, 128], strides = [1, 1]} : vector<64x128xf32> to vector<8x128xf32>
    %cst_24 = arith.constant dense<0.000000e+00> : vector<8x128xf32>
    %112 = tpu.matmul %110, %1, %cst_24 {dimension_numbers = #tpu.dot_dimension_numbers<[1], [0], [0], [1], [0, 0, 1, 1], [], []>} : vector<8x32xf32>, vector<32x128xf32>, vector<8x128xf32> -> vector<8x128xf32>
    %113 = arith.addf %111, %112 : vector<8x128xf32>
    %114 = math.tanh %113 : vector<8x128xf32>
    %115 = vector.broadcast %20 : vector<1x128xf32> to vector<8x128xf32>
    %116 = arith.mulf %114, %115 : vector<8x128xf32>
    %117 = vector.broadcast %23 : vector<1x128xf32> to vector<8x128xf32>
    %118 = arith.addf %116, %117 : vector<8x128xf32>
    %119 = vector.extract_strided_slice %118 {offsets = [0, 0], sizes = [8, 32], strides = [1, 1]} : vector<8x128xf32> to vector<8x32xf32>
    %120 = vector.extract_strided_slice %118 {offsets = [0, 32], sizes = [8, 32], strides = [1, 1]} : vector<8x128xf32> to vector<8x32xf32>
    %121 = vector.extract_strided_slice %118 {offsets = [0, 64], sizes = [8, 32], strides = [1, 1]} : vector<8x128xf32> to vector<8x32xf32>
    %122 = vector.extract_strided_slice %118 {offsets = [0, 96], sizes = [8, 32], strides = [1, 1]} : vector<8x128xf32> to vector<8x32xf32>
    %123 = arith.mulf %120, %108 : vector<8x32xf32>
    %124 = arith.mulf %119, %122 : vector<8x32xf32>
    %125 = arith.addf %123, %124 : vector<8x32xf32>
    %126 = math.tanh %125 : vector<8x32xf32>
    %127 = arith.mulf %121, %126 : vector<8x32xf32>
    %128 = vector.extract_strided_slice %14 {offsets = [48, 0], sizes = [8, 128], strides = [1, 1]} : vector<64x128xf32> to vector<8x128xf32>
    %cst_25 = arith.constant dense<0.000000e+00> : vector<8x128xf32>
    %129 = tpu.matmul %127, %1, %cst_25 {dimension_numbers = #tpu.dot_dimension_numbers<[1], [0], [0], [1], [0, 0, 1, 1], [], []>} : vector<8x32xf32>, vector<32x128xf32>, vector<8x128xf32> -> vector<8x128xf32>
    %130 = arith.addf %128, %129 : vector<8x128xf32>
    %131 = math.tanh %130 : vector<8x128xf32>
    %132 = vector.broadcast %20 : vector<1x128xf32> to vector<8x128xf32>
    %133 = arith.mulf %131, %132 : vector<8x128xf32>
    %134 = vector.broadcast %23 : vector<1x128xf32> to vector<8x128xf32>
    %135 = arith.addf %133, %134 : vector<8x128xf32>
    %136 = vector.extract_strided_slice %135 {offsets = [0, 0], sizes = [8, 32], strides = [1, 1]} : vector<8x128xf32> to vector<8x32xf32>
    %137 = vector.extract_strided_slice %135 {offsets = [0, 32], sizes = [8, 32], strides = [1, 1]} : vector<8x128xf32> to vector<8x32xf32>
    %138 = vector.extract_strided_slice %135 {offsets = [0, 64], sizes = [8, 32], strides = [1, 1]} : vector<8x128xf32> to vector<8x32xf32>
    %139 = vector.extract_strided_slice %135 {offsets = [0, 96], sizes = [8, 32], strides = [1, 1]} : vector<8x128xf32> to vector<8x32xf32>
    %140 = arith.mulf %137, %125 : vector<8x32xf32>
    %141 = arith.mulf %136, %139 : vector<8x32xf32>
    %142 = arith.addf %140, %141 : vector<8x32xf32>
    %143 = math.tanh %142 : vector<8x32xf32>
    %144 = arith.mulf %138, %143 : vector<8x32xf32>
    %145 = vector.extract_strided_slice %14 {offsets = [56, 0], sizes = [8, 128], strides = [1, 1]} : vector<64x128xf32> to vector<8x128xf32>
    %cst_26 = arith.constant dense<0.000000e+00> : vector<8x128xf32>
    %146 = tpu.matmul %144, %1, %cst_26 {dimension_numbers = #tpu.dot_dimension_numbers<[1], [0], [0], [1], [0, 0, 1, 1], [], []>} : vector<8x32xf32>, vector<32x128xf32>, vector<8x128xf32> -> vector<8x128xf32>
    %147 = arith.addf %145, %146 : vector<8x128xf32>
    %148 = math.tanh %147 : vector<8x128xf32>
    %149 = vector.broadcast %20 : vector<1x128xf32> to vector<8x128xf32>
    %150 = arith.mulf %148, %149 : vector<8x128xf32>
    %151 = vector.broadcast %23 : vector<1x128xf32> to vector<8x128xf32>
    %152 = arith.addf %150, %151 : vector<8x128xf32>
    %153 = vector.extract_strided_slice %152 {offsets = [0, 0], sizes = [8, 32], strides = [1, 1]} : vector<8x128xf32> to vector<8x32xf32>
    %154 = vector.extract_strided_slice %152 {offsets = [0, 32], sizes = [8, 32], strides = [1, 1]} : vector<8x128xf32> to vector<8x32xf32>
    %155 = vector.extract_strided_slice %152 {offsets = [0, 64], sizes = [8, 32], strides = [1, 1]} : vector<8x128xf32> to vector<8x32xf32>
    %156 = vector.extract_strided_slice %152 {offsets = [0, 96], sizes = [8, 32], strides = [1, 1]} : vector<8x128xf32> to vector<8x32xf32>
    %157 = arith.mulf %154, %142 : vector<8x32xf32>
    %158 = arith.mulf %153, %156 : vector<8x32xf32>
    %159 = arith.addf %157, %158 : vector<8x32xf32>
    %160 = math.tanh %159 : vector<8x32xf32>
    %161 = arith.mulf %155, %160 : vector<8x32xf32>
    %162 = tpu.concatenate %42, %59, %76, %93, %110, %127, %144, %161 in 0 : vector<8x32xf32>, vector<8x32xf32>, vector<8x32xf32>, vector<8x32xf32>, vector<8x32xf32>, vector<8x32xf32>, vector<8x32xf32>, vector<8x32xf32> -> vector<64x32xf32>
    %cst_27 = arith.constant dense<0.000000e+00> : vector<64x32xf32>
    %163 = tpu.matmul %162, %2, %cst_27 {dimension_numbers = #tpu.dot_dimension_numbers<[1], [0], [0], [1], [0, 0, 1, 1], [], []>} : vector<64x32xf32>, vector<32x32xf32>, vector<64x32xf32> -> vector<64x32xf32>
    %164 = vector.broadcast %6 : vector<1x32xf32> to vector<64x32xf32>
    %165 = arith.addf %163, %164 : vector<64x32xf32>
    %166 = math.tanh %165 : vector<64x32xf32>
    %cst_28 = arith.constant dense<0.000000e+00> : vector<64x32xf32>
    %167 = tpu.matmul %166, %3, %cst_28 {dimension_numbers = #tpu.dot_dimension_numbers<[1], [0], [0], [1], [0, 0, 1, 1], [], []>} : vector<64x32xf32>, vector<32x32xf32>, vector<64x32xf32> -> vector<64x32xf32>
    %168 = vector.broadcast %7 : vector<1x32xf32> to vector<64x32xf32>
    %169 = arith.addf %167, %168 : vector<64x32xf32>
    %170 = math.tanh %169 : vector<64x32xf32>
    %cst_29 = arith.constant dense<0.000000e+00> : vector<64x128xf32>
    %171 = tpu.matmul %170, %4, %cst_29 {dimension_numbers = #tpu.dot_dimension_numbers<[1], [0], [0], [1], [0, 0, 1, 1], [], []>} : vector<64x32xf32>, vector<32x128xf32>, vector<64x128xf32> -> vector<64x128xf32>
    %172 = vector.broadcast %8 : vector<1x128xf32> to vector<64x128xf32>
    %173 = arith.addf %171, %172 : vector<64x128xf32>
    %174 = math.exp %9 : vector<1x4xf32>
    %cst_30 = arith.constant 0.000000e+00 : f32
    %175 = vector.broadcast %cst_30 : f32 to vector<1x4xf32>
    %176 = arith.subf %175, %9 : vector<1x4xf32>
    %177 = math.exp %176 : vector<1x4xf32>
    %178 = vector.extract_strided_slice %173 {offsets = [0, 0], sizes = [64, 4], strides = [1, 1]} : vector<64x128xf32> to vector<64x4xf32>
    %179 = vector.shape_cast %178 : vector<64x4xf32> to vector<8x8x4xf32>
    %c0_31 = arith.constant 0 : index
    %c0_32 = arith.constant 0 : index
    %c0_33 = arith.constant 0 : index
    %180 = vector.load %arg3[%c0_31, %c0_32, %c0_33] : memref<8x8x4xf32, #tpu.memory_space<vmem>>, vector<8x8x4xf32>
    %c0_34 = arith.constant 0 : index
    %c0_35 = arith.constant 0 : index
    %c0_36 = arith.constant 0 : index
    %181 = vector.load %arg4[%c0_34, %c0_35, %c0_36] : memref<8x8x4xf32, #tpu.memory_space<vmem>>, vector<8x8x4xf32>
    %182 = vector.shape_cast %174 : vector<1x4xf32> to vector<1x1x4xf32>
    %183 = vector.broadcast %182 : vector<1x1x4xf32> to vector<8x8x4xf32>
    %184 = arith.mulf %183, %180 : vector<8x8x4xf32>
    %185 = arith.addf %179, %184 : vector<8x8x4xf32>
    %cst_37 = arith.constant -5.000000e-01 : f32
    %186 = vector.broadcast %cst_37 : f32 to vector<8x8x4xf32>
    %187 = arith.mulf %186, %180 : vector<8x8x4xf32>
    %188 = arith.mulf %187, %180 : vector<8x8x4xf32>
    %189 = vector.shape_cast %9 : vector<1x4xf32> to vector<1x1x4xf32>
    %190 = vector.broadcast %189 : vector<1x1x4xf32> to vector<8x8x4xf32>
    %191 = arith.subf %188, %190 : vector<8x8x4xf32>
    %cst_38 = arith.constant 0.918938517 : f32
    %192 = vector.broadcast %cst_38 : f32 to vector<8x8x4xf32>
    %193 = arith.subf %191, %192 : vector<8x8x4xf32>
    %cst_39 = arith.constant dense<0.000000e+00> : vector<8x8xf32>
    %194 = vector.multi_reduction <add>, %193, %cst_39 [2] : vector<8x8x4xf32> to vector<8x8xf32>
    %195 = vector.shape_cast %194 : vector<8x8xf32> to vector<8x8x1xf32>
    %196 = arith.subf %181, %179 : vector<8x8x4xf32>
    %197 = vector.shape_cast %177 : vector<1x4xf32> to vector<1x1x4xf32>
    %198 = vector.broadcast %197 : vector<1x1x4xf32> to vector<8x8x4xf32>
    %199 = arith.mulf %196, %198 : vector<8x8x4xf32>
    %cst_40 = arith.constant -5.000000e-01 : f32
    %200 = vector.broadcast %cst_40 : f32 to vector<8x8x4xf32>
    %201 = arith.mulf %200, %199 : vector<8x8x4xf32>
    %202 = arith.mulf %201, %199 : vector<8x8x4xf32>
    %203 = vector.shape_cast %9 : vector<1x4xf32> to vector<1x1x4xf32>
    %204 = vector.broadcast %203 : vector<1x1x4xf32> to vector<8x8x4xf32>
    %205 = arith.subf %202, %204 : vector<8x8x4xf32>
    %cst_41 = arith.constant 0.918938517 : f32
    %206 = vector.broadcast %cst_41 : f32 to vector<8x8x4xf32>
    %207 = arith.subf %205, %206 : vector<8x8x4xf32>
    %cst_42 = arith.constant dense<0.000000e+00> : vector<8x8xf32>
    %208 = vector.multi_reduction <add>, %207, %cst_42 [2] : vector<8x8x4xf32> to vector<8x8xf32>
    %209 = vector.shape_cast %208 : vector<8x8xf32> to vector<8x8x1xf32>
    %cst_43 = arith.constant 0.000000e+00 : f32
    %210 = vector.broadcast %cst_43 : f32 to vector<8x8x128xf32>
    %c0_44 = arith.constant 0 : index
    %c0_45 = arith.constant 0 : index
    %c0_46 = arith.constant 0 : index
    %211 = vector.load %arg5[%c0_44, %c0_45, %c0_46] : memref<8x8x128xf32, #tpu.memory_space<vmem>>, vector<8x8x128xf32>
    tpu.vector_store %arg5[%c0_44, %c0_45, %c0_46], %210 {strides = array<i32>} : memref<8x8x128xf32, #tpu.memory_space<vmem>>, vector<8x8x128xf32>,
    %c0_47 = arith.constant 0 : index
    %c0_48 = arith.constant 0 : index
    %c0_49 = arith.constant 0 : index
    %212 = vector.load %arg5[%c0_47, %c0_48, %c0_49] : memref<8x8x128xf32, #tpu.memory_space<vmem>>, vector<8x8x4xf32>
    tpu.vector_store %arg5[%c0_47, %c0_48, %c0_49], %185 {strides = array<i32>} : memref<8x8x128xf32, #tpu.memory_space<vmem>>, vector<8x8x4xf32>,
    %c0_50 = arith.constant 0 : index
    %c0_51 = arith.constant 0 : index
    %c4 = arith.constant 4 : index
    %213 = vector.load %arg5[%c0_50, %c0_51, %c4] : memref<8x8x128xf32, #tpu.memory_space<vmem>>, vector<8x8x1xf32>
    tpu.vector_store %arg5[%c0_50, %c0_51, %c4], %209 {strides = array<i32>} : memref<8x8x128xf32, #tpu.memory_space<vmem>>, vector<8x8x1xf32>,
    %c0_52 = arith.constant 0 : index
    %c0_53 = arith.constant 0 : index
    %c5 = arith.constant 5 : index
    %214 = vector.load %arg5[%c0_52, %c0_53, %c5] : memref<8x8x128xf32, #tpu.memory_space<vmem>>, vector<8x8x1xf32>
    tpu.vector_store %arg5[%c0_52, %c0_53, %c5], %195 {strides = array<i32>} : memref<8x8x128xf32, #tpu.memory_space<vmem>>, vector<8x8x1xf32>,
    return
  }
  func.func @transform_0(%arg0: i32) -> (i32, i32) {
    %c0_i32 = arith.constant 0 : i32
    %c0_i32_0 = arith.constant 0 : i32
    %c0_i32_1 = arith.constant 0 : i32
    return %c0_i32, %c0_i32_0 : i32, i32
  }
  func.func @transform_1(%arg0: i32) -> (i32, i32, i32) {
    %c0_i32 = arith.constant 0 : i32
    %c0_i32_0 = arith.constant 0 : i32
    %c0_i32_1 = arith.constant 0 : i32
    return %c0_i32, %arg0, %c0_i32_0 : i32, i32, i32
  }
  func.func @transform_2(%arg0: i32) -> (i32, i32, i32) {
    %c0_i32 = arith.constant 0 : i32
    %c0_i32_0 = arith.constant 0 : i32
    %c0_i32_1 = arith.constant 0 : i32
    return %c0_i32, %arg0, %c0_i32_0 : i32, i32, i32
  }
  func.func @transform_3(%arg0: i32) -> (i32, i32, i32) {
    %c0_i32 = arith.constant 0 : i32
    %c0_i32_0 = arith.constant 0 : i32
    %c0_i32_1 = arith.constant 0 : i32
    return %c0_i32, %arg0, %c0_i32_0 : i32, i32, i32
  }
  func.func @transform_4(%arg0: i32) -> (i32, i32, i32) {
    %c0_i32 = arith.constant 0 : i32
    %c0_i32_0 = arith.constant 0 : i32
    %c0_i32_1 = arith.constant 0 : i32
    return %c0_i32, %arg0, %c0_i32_0 : i32, i32, i32
  }
}

</mosaic_0001>

<bundles_post_ra>
// kernel: lstm_encoder_policy_batched.1
= control target key start
LH: loop header
LB: loop body
LE: loop exit
PB: predicated region body
PF: predicated region fallthrough
CT: control target
= control target key end

     0   :  { %s2683_s15 = smov 0   ;;  %s2685_s16 = smov 0   ;;  %s3228_s0 = inlined_call_operand.vmem [shape: f32[152,128], index: 0, kind: input, shape index: {}]   ;;  %s3229_s1 = inlined_call_operand.vmem [shape: f32[8,16,16], index: 1, kind: input, shape index: {}]   ;;  %s3230_s2 = inlined_call_operand.vmem [shape: f32[8,16,4], index: 2, kind: input, shape index: {}]   ;;  %s3231_s3 = inlined_call_operand.vmem [shape: f32[8,16,4], index: 3, kind: input, shape index: {}]   ;;  %s3232_s4 = inlined_call_operand.vmem [shape: f32[8,16,128], index: 4, kind: output, shape index: {}]  }
   0x1   :  { %s2687_s17 = smov 0  }
   0x2 LB: > { %s2124_s18 = sadd.s32 4294967295, %s2650_s17   ;;  %s2700_s19 = sadd.s32 1, %s2650_s17   ;;  %s2650_s17 = sphi %s2687_s17, %s3237_s17   ;;  %s2646_s16 = sphi %s2685_s16, %s3236_s16   ;;  %s2642_s15 = sphi %s2683_s15, %s3235_s15  }
   0x3   : > { %s39_s20 = ssub.s32 %s2650_s17, %s2700_s19  ;;  %s42_s21 = sadd.s32 1, %s2646_s16 }
   0x4   : > { %p40_p0 = scmp.eq.s32.totalorder %s39_s20, 0  ;;  %p49_p1 = scmp.ne.s32.totalorder %s2646_s16, %s2642_s15 }
   0x5   : > { %p50_p2 = scmp.eq.s32.totalorder %s2650_s17, 0  ;;  %p131_p3 = scmp.eq.s32.totalorder %s2124_s18, 1 }
   0x6   : > { %s2711_s22 = scalar_select %p40_p0, %s2646_s16, %s42_s21  }
   0x7   : > { %p2713_p4 = por %p50_p2, %p49_p1  ;;  %p2717_p5 = por %p131_p3, %p49_p1 }
   0x8   : > { %p2127_p6 = scmp.ge.s32.totalorder %s2650_s17, 2 }
   0xa   : > { %156 = sbr.rel (%p2127_p6) target bundleno = 41 (0x29), region = 20 }
  0x11   : > { %159 = sbr.rel (!%p2713_p4) target bundleno = 25 (0x19), region = 24  ;;  %s161_s25 = sand.u32 (%p2713_p4), 1, %s2646_s16  }
  0x12   : > { %s2129_s26 = sshll.u32 (%p2713_p4), %s2650_s17, 3  ;;  %s2128_s27 = sshll.u32 (%p2713_p4), %s161_s25, 6 }
  0x13   : > { %s165_s30 = scalar_lea.vmem (%p2713_p4), %s3229_s1, %s2129_s26  ;;  %s163_s5 = scalar_lea.vmem (%p2713_p4), [#allocation2], %s2128_s27 }
  0x14   : > { %v207_v0 = vld [vmem:[%s165_s30] sm:$0xff] (%p2713_p4)  ;;  %v209_v1 = vld [vmem:[%s165_s30 + $0x10] sm:$0xff] (%p2713_p4) }
  0x15   : > { %v211_v2 = vld [vmem:[%s165_s30 + $0x20] sm:$0xff] (%p2713_p4)  ;;  %208 = vst [vmem:[%s163_s5] sm:$0xff] (%p2713_p4), %v207_v0  ;;  %210 = vst [vmem:[%s163_s5 + $0x8] sm:$0xff] (%p2713_p4), %v209_v1  ;;  %v213_v3 = vld [vmem:[%s165_s30 + $0x30] sm:$0xff] (%p2713_p4) }
  0x16   : > { %212 = vst [vmem:[%s163_s5 + $0x10] sm:$0xff] (%p2713_p4), %v211_v2  ;;  %v215_v4 = vld [vmem:[%s165_s30 + $0x40] sm:$0xff] (%p2713_p4)  ;;  %v217_v5 = vld [vmem:[%s165_s30 + $0x50] sm:$0xff] (%p2713_p4)  ;;  %214 = vst [vmem:[%s163_s5 + $0x18] sm:$0xff] (%p2713_p4), %v213_v3 }
  0x17   : > { %216 = vst [vmem:[%s163_s5 + $0x20] sm:$0xff] (%p2713_p4), %v215_v4  ;;  %218 = vst [vmem:[%s163_s5 + $0x28] sm:$0xff] (%p2713_p4), %v217_v5  ;;  %v219_v6 = vld [vmem:[%s165_s30 + $0x60] sm:$0xff] (%p2713_p4)  ;;  %v221_v7 = vld [vmem:[%s165_s30 + $0x70] sm:$0xff] (%p2713_p4) }
  0x18   : > { %220 = vst [vmem:[%s163_s5 + $0x30] sm:$0xff] %v219_v6  ;;  %222 = vst [vmem:[%s163_s5 + $0x38] sm:$0xff] %v221_v7 }
  0x19 PF: > { %228 = sbr.rel (!%p2713_p4) target bundleno = 33 (0x21), region = 62  ;;  %s230_s6 = sand.u32 (%p2713_p4), 1, %s2646_s16  }
  0x1a   : > { %s2131_s7 = sshll.u32 (%p2713_p4), %s2650_s17, 3  ;;  %s2130_s8 = sshll.u32 (%p2713_p4), %s230_s6, 6 }
  0x1b   : > { %s234_s11 = scalar_lea.vmem (%p2713_p4), %s3230_s2, %s2131_s7  ;;  %s232_s12 = scalar_lea.vmem (%p2713_p4), [#allocation3], %s2130_s8 }
  0x1c   : > { %v276_v8 = vld [vmem:[%s234_s11] sm:$0xff] (%p2713_p4)  ;;  %v278_v9 = vld [vmem:[%s234_s11 + $0x10] sm:$0xff] (%p2713_p4) }
  0x1d   : > { %v280_v10 = vld [vmem:[%s234_s11 + $0x20] sm:$0xff] (%p2713_p4)  ;;  %277 = vst [vmem:[%s232_s12] sm:$0xff] (%p2713_p4), %v276_v8  ;;  %279 = vst [vmem:[%s232_s12 + $0x8] sm:$0xff] (%p2713_p4), %v278_v9  ;;  %v282_v11 = vld [vmem:[%s234_s11 + $0x30] sm:$0xff] (%p2713_p4) }
  0x1e   : > { %281 = vst [vmem:[%s232_s12 + $0x10] sm:$0xff] (%p2713_p4), %v280_v10  ;;  %v284_v12 = vld [vmem:[%s234_s11 + $0x40] sm:$0xff] (%p2713_p4)  ;;  %v286_v13 = vld [vmem:[%s234_s11 + $0x50] sm:$0xff] (%p2713_p4)  ;;  %283 = vst [vmem:[%s232_s12 + $0x18] sm:$0xff] (%p2713_p4), %v282_v11 }
  0x1f   : > { %285 = vst [vmem:[%s232_s12 + $0x20] sm:$0xff] (%p2713_p4), %v284_v12  ;;  %287 = vst [vmem:[%s232_s12 + $0x28] sm:$0xff] (%p2713_p4), %v286_v13  ;;  %v288_v14 = vld [vmem:[%s234_s11 + $0x60] sm:$0xff] (%p2713_p4)  ;;  %v290_v15 = vld [vmem:[%s234_s11 + $0x70] sm:$0xff] (%p2713_p4) }
  0x20   : > { %289 = vst [vmem:[%s232_s12 + $0x30] sm:$0xff] %v288_v14  ;;  %291 = vst [vmem:[%s232_s12 + $0x38] sm:$0xff] %v290_v15 }
  0x21 PF: > { %297 = sbr.rel (!%p2713_p4) target bundleno = 41 (0x29), region = 100  ;;  %s299_s13 = sand.u32 (%p2713_p4), 1, %s2646_s16  }
  0x22   : > { %s2133_s14 = sshll.u32 (%p2713_p4), %s2650_s17, 3  ;;  %s2132_s20 = sshll.u32 (%p2713_p4), %s299_s13, 6 }
  0x23   : > { %s303_s26 = scalar_lea.vmem (%p2713_p4), %s3231_s3, %s2133_s14  ;;  %s301_s27 = scalar_lea.vmem (%p2713_p4), [#allocation4], %s2132_s20 }
  0x24   : > { %v345_v16 = vld [vmem:[%s303_s26] sm:$0xff] (%p2713_p4)  ;;  %v347_v17 = vld [vmem:[%s303_s26 + $0x10] sm:$0xff] (%p2713_p4) }
  0x25   : > { %v349_v18 = vld [vmem:[%s303_s26 + $0x20] sm:$0xff] (%p2713_p4)  ;;  %346 = vst [vmem:[%s301_s27] sm:$0xff] (%p2713_p4), %v345_v16  ;;  %348 = vst [vmem:[%s301_s27 + $0x8] sm:$0xff] (%p2713_p4), %v347_v17  ;;  %v351_v19 = vld [vmem:[%s303_s26 + $0x30] sm:$0xff] (%p2713_p4) }
  0x26   : > { %350 = vst [vmem:[%s301_s27 + $0x10] sm:$0xff] (%p2713_p4), %v349_v18  ;;  %v353_v20 = vld [vmem:[%s303_s26 + $0x40] sm:$0xff] (%p2713_p4)  ;;  %v355_v21 = vld [vmem:[%s303_s26 + $0x50] sm:$0xff] (%p2713_p4)  ;;  %352 = vst [vmem:[%s301_s27 + $0x18] sm:$0xff] (%p2713_p4), %v351_v19 }
  0x27   : > { %354 = vst [vmem:[%s301_s27 + $0x20] sm:$0xff] (%p2713_p4), %v353_v20  ;;  %356 = vst [vmem:[%s301_s27 + $0x28] sm:$0xff] (%p2713_p4), %v355_v21  ;;  %v357_v22 = vld [vmem:[%s303_s26 + $0x60] sm:$0xff] (%p2713_p4)  ;;  %v359_v23 = vld [vmem:[%s303_s26 + $0x70] sm:$0xff] (%p2713_p4) }
  0x28   : > { %358 = vst [vmem:[%s301_s27 + $0x30] sm:$0xff] %v357_v22  ;;  %360 = vst [vmem:[%s301_s27 + $0x38] sm:$0xff] %v359_v23 }
  0x29 PF: > { %p2134_p7 = scmp.ge.s32.totalorder %s2650_s17, 1  ;;  %p365_p8 = scmp.lt.s32.totalorder %s2650_s17, 3 }
  0x2b   : > { %p366_p9 = pnand %p2134_p7, %p365_p8 }
  0x2c   : > { %v418_v24 = vld [vmem:[%s3228_s0] sm:$0xff] (!%p366_p9)  ;;  %v419_v25 = vld [vmem:[%s3228_s0 + $0x8] sm:$0xff] (!%p366_p9)  ;;  %s372_s5 = sand.u32 (!%p366_p9), 1, %s2642_s15   ;;  %vm453_vm0 = vcmask (!%p366_p9), 130048   ;;  %v420_v27 = vld [vmem:[%s3228_s0 + $0x10] sm:$0xff] (!%p366_p9)  ;;  %v2652_v30 = vmov (!%p366_p9), 0.0   ;;  %v583_v45 = vlaneseq (!%p366_p9) }
  0x2d   : > { %369 = sbr.rel (%p366_p9) target bundleno = 6544 (0x1990), region = 138  ;;  %v2452_v26 = vpack.c.bf16 (!%p366_p9), %v419_v25, %v418_v24  ;;  %s2752_s6 = sshll.u32 (!%p366_p9), %s372_s5, 6  ;;  %v421_v28 = vld [vmem:[%s3228_s0 + $0x18] sm:$0xff] (!%p366_p9)  ;;  %v2653_v34 = vmov (!%p366_p9), 0.0|0.0   ;;  %v422_v36 = vld [vmem:[%s3228_s0 + $0x20] sm:$0xff] (!%p366_p9)  ;;  %v423_v37 = vld [vmem:[%s3228_s0 + $0x28] sm:$0xff] (!%p366_p9) }
  0x2e   : > { %s2761_s11 = scalar_lea.vmem (!%p366_p9), [#allocation2], %s2752_s6  ;;  %s2765_s15 = scalar_lea.vmem (!%p366_p9), [#allocation5], %s2752_s6  ;;  %v2785_v32 = vpack.c.bf16 (!%p366_p9), %v421_v28, %v420_v27  ;;  %v2803_v40 = vpack.c.bf16 (!%p366_p9), %v423_v37, %v422_v36  ;;  %vm2654_vm1 = vmmov (!%p366_p9), 0   ;;  %v2826_v41 = vld [vmem:[%s3228_s0 + $0x94] sm:$0x1] (!%p366_p9)  ;;  %v1773_v46 = vshrl.u32 (!%p366_p9), %v583_v45, 7 }
  0x2f   : > { %2528 = vmatprep.subr.bf16.mxu1 (!%p366_p9), %v2452_v26  ;;  %v445_v29 = vld [vmem:[%s2761_s11 + $0x20] sm:$0xff] (!%p366_p9)  ;;  %2453 = vmatprep.subr.bf16.mxu0 (!%p366_p9), %v2452_v26  ;;  %1929 = vst [vmem:[%s2765_s15] sm:$0xff] (!%p366_p9), %v2652_v30  ;;  %1930 = vst [vmem:[%s2765_s15 + $0x8] sm:$0xff] (!%p366_p9), %v2652_v30  ;;  %v446_v31 = vld [vmem:[%s2761_s11 + $0x28] sm:$0xff] (!%p366_p9)  ;;  %v1751_v42 = vmul.f32 (!%p366_p9), 1.442695, %v2826_v41  ;;  %v1753_v43 = vsub.f32 (!%p366_p9), 0.0, %v2826_v41 }
  0x30   : > { %1931 = vst [vmem:[%s2765_s15 + $0x10] sm:$0xff] (!%p366_p9), %v2652_v30  ;;  %1932 = vst [vmem:[%s2765_s15 + $0x18] sm:$0xff] (!%p366_p9), %v2652_v30  ;;  %2529 = vmatpush3.bf16.msra.mxu1 (!%p366_p9), %v2452_v26  ;;  %2298 = vmatprep.mubr.msk.f32.mxu1 (!%p366_p9), %vm453_vm0, %v445_v29  ;;  %v441_v33 = vld [vmem:[%s2761_s11] sm:$0xff] (!%p366_p9)  ;;  %v447_v35 = vld [vmem:[%s2761_s11 + $0x30] sm:$0xff] (!%p366_p9)  ;;  %v2830_v47 = vsub.s32 (!%p366_p9), 0, %v1773_v46  ;;  %v584_v63 = vand.u32 (!%p366_p9), 127, %v583_v45 }
  0x31   : > { %1933 = vst [vmem:[%s2765_s15 + $0x20] sm:$0xff] (!%p366_p9), %v2652_v30  ;;  %1934 = vst [vmem:[%s2765_s15 + $0x28] sm:$0xff] (!%p366_p9), %v2652_v30  ;;  %2456 = vmatprep.subr.bf16.mxu1 (!%p366_p9), %v2653_v34  ;;  %2455 = vmatpush3.bf16.msra.mxu0 (!%p366_p9), %v2452_v26  ;;  %v442_v38 = vld [vmem:[%s2761_s11 + $0x8] sm:$0xff] (!%p366_p9)  ;;  %v448_v39 = vld [vmem:[%s2761_s11 + $0x38] sm:$0xff] (!%p366_p9)  ;;  %2560 = vpow2.f32 (!%p366_p9), %v1751_v42  ;;  %v1754_v44 = vmul.f32 (!%p366_p9), 1.442695, %v1753_v43 }
  0x32   : > { %1935 = vst [vmem:[%s2765_s15 + $0x30] sm:$0xff] (!%p366_p9), %v2652_v30  ;;  %1936 = vst [vmem:[%s2765_s15 + $0x38] sm:$0xff] (!%p366_p9), %v2652_v30  ;;  %2292 = vmatprep.mubr.msk.f32.mxu0 (!%p366_p9), %vm453_vm0, %v441_v33  ;;  %2468 = vmatprep.subr.bf16.mxu0 (!%p366_p9), %v2653_v34  ;;  %v2845_v56 = vld [vmem:[%s3228_s0 + $0x90] ss:$0 sm:$0xff] (!%p366_p9)  ;;  %vm585_vm2 = vcmp.lt.s32.totalorder (!%p366_p9), %v584_v63, 96  ;;  %v2655_v0 = vmov (!%p366_p9), 1.0  }
  0x33   : > { %2299 = vmatmul.mubr.msk.f32.vlgmr.msra.gmra.mrb[0].mxu1 (!%p366_p9), %vm453_vm0, %v446_v31  ;;  %2562 = vpow2.f32 (!%p366_p9), %v1754_v44  ;;  %v2852_v1 = vsel (!%p366_p9), %vm585_vm2, 0.5, %v2655_v0  ;;  %v2855_v3 = vsel (!%p366_p9), %vm585_vm2, 0.5, %v2652_v30  ;;  %s2656_s23 = smov (!%p366_p9), 32   ;;  %s2657_s28 = smov (!%p366_p9), 64   ;;  %vm588_vm3 = vcmask (!%p366_p9), 261120   ;;  %v443_v27 = vld [vmem:[%s2761_s11 + $0x10] sm:$0xff] (!%p366_p9) }
  0x34   : > { %2458 = vmatpush3.bf16.msra.mxu1 %v2785_v32  ;;  %2301 = vmatprep.mubr.msk.f32.mxu1 %vm453_vm0, %v447_v35  ;;  %v444_v28 = vld [vmem:[%s2761_s11 + $0x18] sm:$0xff]  ;;  %vm1828_vm4 = vcmask 31744   ;;  %s3093_s25 = scalar_lea.vmem [#allocation4], %s2752_s6  ;;  %vm1945_vm5 = vcmask 39968   ;;  %vm1954_vm6 = vcmask 48168  }
  0x35   : > { %2459 = vmatprep.subr.bf16.mxu1 %v2653_v34  ;;  %2293 = vmatmul.mubr.msk.f32.vlgmr.msra.gmra.mrb[0].mxu0 %vm453_vm0, %v442_v38 }
  0x36   : > { %2470 = vmatpush3.bf16.msra.mxu0 %v2785_v32  ;;  %2295 = vmatprep.mubr.msk.f32.mxu0 %vm453_vm0, %v443_v27 }
  0x37   : > { %2302 = vmatmul.mubr.msk.f32.gmra.mrb[2].mxu1 %vm453_vm0, %v448_v39  ;;  %2471 = vmatprep.subr.bf16.mxu0 %v2653_v34 }
  0x38   : > { %2461 = vmatpush3.bf16.msra.mxu1 %v2803_v40  ;;  %2312 = vmatprep.mubr.msk.f32.mxu1 %vm2654_vm1, %v2652_v30 }
  0x39   : > { %2462 = vmatprep.subr.bf16.mxu1 %v2653_v34  ;;  %2296 = vmatmul.mubr.msk.f32.gmra.mrb[2].mxu0 %vm453_vm0, %v444_v28 }
  0x3a   : > { %2473 = vmatpush3.bf16.msra.mxu0 %v2803_v40  ;;  %2334 = vmatprep.mubr.msk.f32.mxu0 %vm2654_vm1, %v2652_v30 }
  0x3b   : > { %2313 = vmatmul.mubr.f32.vlgmr.msra.gmra.mrb[4].mxu1 %v2652_v30  ;;  %2480 = vmatprep.subr.bf16.mxu0 %v2653_v34  ;;  %v2561_v48 = vpop.eup %2560 }
  0x3c   : > { %2464 = vmatpush3.bf16.msra.mxu1 %v2785_v32  ;;  %2323 = vmatprep.mubr.msk.f32.mxu1 %vm2654_vm1, %v2652_v30  ;;  %v2833_v49 = vrot.slane %v2561_v48, %v2830_v47 }
  0x3d   : > { %2465 = vmatprep.subr.bf16.mxu1 %v2653_v34  ;;  %v2563_v50 = vpop.eup %2562 }
  0x3e   : > { %v2836_v51 = vrot.slane %v2563_v50, %v2830_v47 }
  0x40   : > { %2467 = vmatpush3.bf16.msra.mxu1 %v2803_v40 }
  0x41   : > { %2474 = vmatprep.subr.bf16.mxu1 %v2653_v34 }
 0x106   : > { %v2838_v52 = vpop.f32.mrb[0].mxu1 }
 0x107   : > { %v2840_v53 = vpop.f32.mrb[1].mxu1 }
 0x108   : > { %v2294_v54 = vpop.f32.mrb[0].mxu0 }
 0x109   : > { %v544_v55 = vpop.f32.mrb[1].mxu0  ;;  %v550_v15 = vadd.f32 %v2294_v54, %v2845_v56 }
 0x10a   : > { %v2847_v57 = vpop.f32.mrb[2].mxu1  ;;  %v545_v59 = vadd.f32 %v2845_v56, %v544_v55 }
 0x10b   : > { %v2849_v58 = vpop.f32.mrb[3].mxu1 }
 0x10c   : > { %v2297_v35 = vpop.f32.mrb[2].mxu0 }
 0x10d   : > { %v554_v36 = vpop.f32.mrb[3].mxu0  ;;  %v560_v0 = vadd.f32 %v2297_v35, %v2845_v56 }
 0x10e   : > { %v658_v60 = vpop.f32.mrb[4].mxu1  ;;  %v555_v38 = vadd.f32 %v2845_v56, %v554_v36 }
 0x10f   : > { %v662_v61 = vadd.f32 %v658_v60, %v545_v59  ;;  %v2314_v62 = vpop.f32.mrb[5].mxu1 }
 0x111   : > { %2564 = vtanh.f32 %v662_v61 }
 0x11b   : > { %v2565_v2 = vpop.eup %2564 }
 0x11c   : > { %v664_v4 = vmul.f32 %v2565_v2, %v2852_v1 }
 0x11e   : > { %v665_v5 = vadd.f32 %v664_v4, %v2855_v3 }
 0x120   : > { %668 = vrot.lane.b32.xlu0 %v665_v5, %s2656_s23  ;;  %v666_v8 = vmul.f32 0.0, %v665_v5 }
 0x192   : > { %v669_v6 = vpop.permute.xlu0 %668 }
 0x193   : > { %v671_v7 = vmul.f32 %v669_v6, %v665_v5 }
 0x195   : > { %673 = vrot.lane.b32.xlu0 %v671_v7, %s2656_s23 }
 0x207   : > { %v674_v9 = vpop.permute.xlu0 %673 }
 0x208   : > { %v676_v10 = vadd.f32 %v674_v9, %v666_v8 }
 0x20a   : > { %2566 = vtanh.f32 %v676_v10 }
 0x214   : > { %v2567_v11 = vpop.eup %2566 }
 0x215   : > { %679 = vrot.lane.b32.xlu1 %v2567_v11, %s2656_s23 }
 0x287   : > { %v680_v12 = vpop.permute.xlu1 %679 }
 0x288   : > { %v682_v13 = vmul.f32 %v680_v12, %v665_v5 }
 0x28a   : > { %684 = vrot.lane.b32.xlu1 %v682_v13, %s2657_s28 }
 0x2fc   : > { %v2863_v14 = vpop.permute.xlu1 %684 }
 0x2fd   : > { %2324 = vmatmul.mubr.msk.f32.vlgmr.msra.gmra.mrb[6].mxu1 %vm588_vm3, %v2863_v14 }
 0x2fe   : > { %2476 = vmatpush3.bf16.msra.mxu1 %v2785_v32  ;;  %2345 = vmatprep.mubr.msk.f32.mxu1 %vm2654_vm1, %v2652_v30 }
 0x2ff   : > { %2477 = vmatprep.subr.bf16.mxu1 %v2653_v34 }
 0x302   : > { %2479 = vmatpush3.bf16.msra.mxu1 %v2803_v40 }
 0x303   : > { %2486 = vmatprep.subr.bf16.mxu1 %v2653_v34 }
 0x3d0   : > { %v754_v16 = vpop.f32.mrb[6].mxu1 }
 0x3d1   : > { %v758_v17 = vadd.f32 %v754_v16, %v550_v15  ;;  %v2325_v18 = vpop.f32.mrb[7].mxu1 }
 0x3d3   : > { %2568 = vtanh.f32 %v758_v17 }
 0x3dd   : > { %v2569_v19 = vpop.eup %2568 }
 0x3de   : > { %v760_v20 = vmul.f32 %v2569_v19, %v2852_v1  ;;  %v565_v19 = vadd.f32 %v2845_v56, %v2840_v53 }
 0x3e0   : > { %v761_v21 = vadd.f32 %v760_v20, %v2855_v3 }
 0x3e2   : > { %764 = vrot.lane.b32.xlu0 %v761_v21, %s2656_s23  ;;  %v762_v24 = vmul.f32 %v761_v21, %v676_v10 }
 0x454   : > { %v765_v22 = vpop.permute.xlu0 %764 }
 0x455   : > { %v767_v23 = vmul.f32 %v765_v22, %v761_v21 }
 0x457   : > { %769 = vrot.lane.b32.xlu1 %v767_v23, %s2656_s23 }
 0x4c9   : > { %v770_v25 = vpop.permute.xlu1 %769 }
 0x4ca   : > { %v772_v26 = vadd.f32 %v770_v25, %v762_v24 }
 0x4cc   : > { %2570 = vtanh.f32 %v772_v26 }
 0x4d6   : > { %v2571_v29 = vpop.eup %2570 }
 0x4d7   : > { %775 = vrot.lane.b32.xlu0 %v2571_v29, %s2656_s23 }
 0x549   : > { %v776_v31 = vpop.permute.xlu0 %775 }
 0x54a   : > { %v778_v33 = vmul.f32 %v776_v31, %v761_v21 }
 0x54c   : > { %780 = vrot.lane.b32.xlu1 %v778_v33, %s2657_s28 }
 0x5be   : > { %v2886_v37 = vpop.permute.xlu1 %780 }
 0x5bf   : > { %2335 = vmatmul.mubr.msk.f32.vlgmr.msra.gmra.mrb[4].mxu0 %vm588_vm3, %v2886_v37 }
 0x5c0   : > { %2482 = vmatpush3.bf16.msra.mxu0 %v2785_v32  ;;  %2356 = vmatprep.mubr.msk.f32.mxu0 %vm2654_vm1, %v2652_v30 }
 0x5c1   : > { %2483 = vmatprep.subr.bf16.mxu0 %v2653_v34 }
 0x5c4   : > { %2485 = vmatpush3.bf16.msra.mxu0 %v2803_v40 }
 0x5c5   : > { %2492 = vmatprep.subr.bf16.mxu0 %v2653_v34 }
 0x692   : > { %v850_v39 = vpop.f32.mrb[4].mxu0 }
 0x693   : > { %v854_v42 = vadd.f32 %v850_v39, %v555_v38  ;;  %v2336_v43 = vpop.f32.mrb[5].mxu0  ;;  %v570_v38 = vadd.f32 %v2838_v52, %v2845_v56  ;;  %v424_v52 = vld [vmem:[%s3228_s0 + $0x30] sm:$0xff] }
 0x695   : > { %2572 = vtanh.f32 %v854_v42 }
 0x69f   : > { %v2573_v44 = vpop.eup %2572 }
 0x6a0   : > { %v856_v45 = vmul.f32 %v2573_v44, %v2852_v1 }
 0x6a2   : > { %v857_v46 = vadd.f32 %v856_v45, %v2855_v3 }
 0x6a4   : > { %860 = vrot.lane.b32.xlu0 %v857_v46, %s2656_s23  ;;  %v858_v54 = vmul.f32 %v857_v46, %v772_v26 }
 0x716   : > { %v861_v48 = vpop.permute.xlu0 %860 }
 0x717   : > { %v863_v50 = vmul.f32 %v861_v48, %v857_v46 }
 0x719   : > { %865 = vrot.lane.b32.xlu1 %v863_v50, %s2656_s23  ;;  %v425_v50 = vld [vmem:[%s3228_s0 + $0x38] sm:$0xff] }
 0x78b   : > { %v866_v55 = vpop.permute.xlu1 %865 }
 0x78c   : > { %v868_v59 = vadd.f32 %v866_v55, %v858_v54  ;;  %v2504_v54 = vpack.c.bf16 %v425_v50, %v424_v52 }
 0x78e   : > { %2574 = vtanh.f32 %v868_v59 }
 0x798   : > { %v2575_v60 = vpop.eup %2574 }
 0x799   : > { %871 = vrot.lane.b32.xlu0 %v2575_v60, %s2656_s23 }
 0x80b   : > { %v872_v61 = vpop.permute.xlu0 %871 }
 0x80c   : > { %v874_v62 = vmul.f32 %v872_v61, %v857_v46  ;;  %v426_v61 = vld [vmem:[%s3228_s0 + $0x40] sm:$0xff] }
 0x80e   : > { %876 = vrot.lane.b32.xlu1 %v874_v62, %s2657_s28  ;;  %v427_v62 = vld [vmem:[%s3228_s0 + $0x48] sm:$0xff] }
 0x880   : > { %v2903_v63 = vpop.permute.xlu1 %876 }
 0x881   : > { %2346 = vmatmul.mubr.msk.f32.vlgmr.msra.gmra.mrb[8].mxu1 %vm588_vm3, %v2903_v63 }
 0x882   : > { %2488 = vmatpush3.bf16.msra.mxu1 %v2785_v32  ;;  %2367 = vmatprep.mubr.msk.f32.mxu1 %vm2654_vm1, %v2652_v30 }
 0x883   : > { %2489 = vmatprep.subr.bf16.mxu1 %v2653_v34 }
 0x886   : > { %2491 = vmatpush3.bf16.msra.mxu1 %v2803_v40 }
 0x887   : > { %2498 = vmatprep.subr.bf16.mxu1 %v2653_v34 }
 0x954   : > { %v946_v2 = vpop.f32.mrb[8].mxu1 }
 0x955   : > { %v950_v4 = vadd.f32 %v946_v2, %v560_v0  ;;  %v2347_v5 = vpop.f32.mrb[9].mxu1  ;;  %v2508_v0 = vpack.c.bf16 %v427_v62, %v426_v61 }
 0x957   : > { %2576 = vtanh.f32 %v950_v4  ;;  %v575_v4 = vadd.f32 %v2845_v56, %v2849_v58 }
 0x961   : > { %v2577_v6 = vpop.eup %2576 }
 0x962   : > { %v952_v7 = vmul.f32 %v2577_v6, %v2852_v1 }
 0x964   : > { %v953_v8 = vadd.f32 %v952_v7, %v2855_v3 }
 0x966   : > { %956 = vrot.lane.b32.xlu0 %v953_v8, %s2656_s23  ;;  %v954_v11 = vmul.f32 %v953_v8, %v868_v59 }
 0x9d8   : > { %v957_v9 = vpop.permute.xlu0 %956 }
 0x9d9   : > { %v959_v10 = vmul.f32 %v957_v9, %v953_v8 }
 0x9db   : > { %961 = vrot.lane.b32.xlu1 %v959_v10, %s2656_s23 }
 0xa4d   : > { %v962_v12 = vpop.permute.xlu1 %961 }
 0xa4e   : > { %v964_v13 = vadd.f32 %v962_v12, %v954_v11 }
 0xa50   : > { %2578 = vtanh.f32 %v964_v13 }
 0xa5a   : > { %v2579_v15 = vpop.eup %2578 }
 0xa5b   : > { %967 = vrot.lane.b32.xlu0 %v2579_v15, %s2656_s23 }
 0xacd   : > { %v968_v16 = vpop.permute.xlu0 %967 }
 0xace   : > { %v970_v17 = vmul.f32 %v968_v16, %v953_v8 }
 0xad0   : > { %972 = vrot.lane.b32.xlu1 %v970_v17, %s2657_s28 }
 0xb42   : > { %v2920_v18 = vpop.permute.xlu1 %972 }
 0xb43   : > { %2357 = vmatmul.mubr.msk.f32.vlgmr.msra.gmra.mrb[6].mxu0 %vm588_vm3, %v2920_v18 }
 0xb44   : > { %2494 = vmatpush3.bf16.msra.mxu0 %v2785_v32  ;;  %2378 = vmatprep.mubr.msk.f32.mxu0 %vm2654_vm1, %v2652_v30 }
 0xb45   : > { %2495 = vmatprep.subr.bf16.mxu0 %v2653_v34 }
 0xb48   : > { %2497 = vmatpush3.bf16.msra.mxu0 %v2803_v40 }
 0xb49   : > { %2505 = vmatprep.subr.bf16.mxu0 %v2504_v54 }
 0xc16   : > { %v1042_v20 = vpop.f32.mrb[6].mxu0 }
 0xc17   : > { %v1046_v21 = vadd.f32 %v1042_v20, %v565_v19  ;;  %v2358_v22 = vpop.f32.mrb[7].mxu0  ;;  %v428_v19 = vld [vmem:[%s3228_s0 + $0x50] sm:$0xff]  ;;  %v429_v20 = vld [vmem:[%s3228_s0 + $0x58] sm:$0xff] }
 0xc19   : > { %2580 = vtanh.f32 %v1046_v21  ;;  %v2512_v21 = vpack.c.bf16 %v429_v20, %v428_v19 }
 0xc23   : > { %v2581_v23 = vpop.eup %2580 }
 0xc24   : > { %v1048_v24 = vmul.f32 %v2581_v23, %v2852_v1 }
 0xc26   : > { %v1049_v25 = vadd.f32 %v1048_v24, %v2855_v3 }
 0xc28   : > { %1052 = vrot.lane.b32.xlu0 %v1049_v25, %s2656_s23  ;;  %v1050_v28 = vmul.f32 %v1049_v25, %v964_v13 }
 0xc9a   : > { %v1053_v26 = vpop.permute.xlu0 %1052 }
 0xc9b   : > { %v1055_v27 = vmul.f32 %v1053_v26, %v1049_v25 }
 0xc9d   : > { %1057 = vrot.lane.b32.xlu1 %v1055_v27, %s2656_s23 }
 0xd0f   : > { %v1058_v29 = vpop.permute.xlu1 %1057 }
 0xd10   : > { %v1060_v31 = vadd.f32 %v1058_v29, %v1050_v28  ;;  %v430_v29 = vld [vmem:[%s3228_s0 + $0x60] sm:$0xff] }
 0xd12   : > { %2582 = vtanh.f32 %v1060_v31 }
 0xd1c   : > { %v2583_v53 = vpop.eup %2582 }
 0xd1d   : > { %1063 = vrot.lane.b32.xlu0 %v2583_v53, %s2656_s23 }
 0xd8f   : > { %v1064_v33 = vpop.permute.xlu0 %1063 }
 0xd90   : > { %v1066_v35 = vmul.f32 %v1064_v33, %v1049_v25  ;;  %v2994_v25 = vld [vmem:[%s3228_s0 + $0x91] ss:$0 sm:$0xff] }
 0xd92   : > { %1068 = vrot.lane.b32.xlu1 %v1066_v35, %s2657_s28 }
 0xe04   : > { %v1069_v36 = vpop.permute.xlu1 %1068 }
 0xe05   : > { %2368 = vmatmul.mubr.msk.f32.vlgmr.msra.gmra.mrb[10].mxu1 %vm588_vm3, %v1069_v36 }
 0xe06   : > { %2500 = vmatpush3.bf16.msra.mxu1 %v2785_v32  ;;  %2389 = vmatprep.mubr.msk.f32.mxu1 %vm2654_vm1, %v2652_v30 }
 0xe07   : > { %2501 = vmatprep.subr.bf16.mxu1 %v2653_v34 }
 0xe0a   : > { %2503 = vmatpush3.bf16.msra.mxu1 %v2803_v40 }
 0xe0b   : > { %2513 = vmatprep.subr.bf16.mxu1 %v2512_v21 }
 0xed8   : > { %v1138_v39 = vpop.f32.mrb[10].mxu1 }
 0xed9   : > { %v1142_v42 = vadd.f32 %v1138_v39, %v570_v38  ;;  %v2369_v43 = vpop.f32.mrb[11].mxu1 }
 0xedb   : > { %2584 = vtanh.f32 %v1142_v42 }
 0xee5   : > { %v2585_v44 = vpop.eup %2584 }
 0xee6   : > { %v1144_v45 = vmul.f32 %v2585_v44, %v2852_v1 }
 0xee8   : > { %v1145_v46 = vadd.f32 %v1144_v45, %v2855_v3 }
 0xeea   : > { %1148 = vrot.lane.b32.xlu0 %v1145_v46, %s2656_s23  ;;  %v1146_v34 = vmul.f32 %v1145_v46, %v1060_v31  ;;  %v431_v31 = vld [vmem:[%s3228_s0 + $0x68] sm:$0xff] }
 0xeeb   : > { %v2516_v35 = vpack.c.bf16 %v431_v31, %v430_v29 }
 0xf5c   : > { %v1149_v32 = vpop.permute.xlu0 %1148 }
 0xf5d   : > { %v1151_v30 = vmul.f32 %v1149_v32, %v1145_v46  ;;  %v580_v32 = vadd.f32 %v2847_v57, %v2845_v56 }
 0xf5f   : > { %1153 = vrot.lane.b32.xlu1 %v1151_v30, %s2656_s23 }
 0xfd1   : > { %v1154_v40 = vpop.permute.xlu1 %1153 }
 0xfd2   : > { %v1156_v48 = vadd.f32 %v1154_v40, %v1146_v34 }
 0xfd4   : > { %2586 = vtanh.f32 %v1156_v48 }
 0xfde   : > { %v2587_v55 = vpop.eup %2586 }
 0xfdf   : > { %1159 = vrot.lane.b32.xlu0 %v2587_v55, %s2656_s23 }
0x1051   : > { %v1160_v59 = vpop.permute.xlu0 %1159 }
0x1052   : > { %v1162_v60 = vmul.f32 %v1160_v59, %v1145_v46 }
0x1054   : > { %1164 = vrot.lane.b32.xlu1 %v1162_v60, %s2657_s28 }
0x10c6   : > { %v1165_v2 = vpop.permute.xlu1 %1164 }
0x10c7   : > { %2379 = vmatmul.mubr.msk.f32.vlgmr.msra.gmra.mrb[8].mxu0 %vm588_vm3, %v1165_v2 }
0x10c8   : > { %2507 = vmatpush3.bf16.msra.mxu0 %v2504_v54  ;;  %2400 = vmatprep.mubr.msk.f32.mxu0 %vm588_vm3, %v2863_v14 }
0x10c9   : > { %2509 = vmatprep.subr.bf16.mxu0 %v2508_v0 }
0x10cc   : > { %2511 = vmatpush3.bf16.msra.mxu0 %v2508_v0 }
0x10cf   : > { %2401 = vmatmul.mubr.msk.f32.vlgmr.msra.gmra.mrb[10].mxu0 %vm588_vm3, %v2886_v37 }
0x10d0   : > { %2403 = vmatprep.mubr.msk.f32.mxu0 %vm588_vm3, %v2903_v63 }
0x10d3   : > { %2404 = vmatmul.mubr.msk.f32.gmra.mrb[12].mxu0 %vm588_vm3, %v2920_v18 }
0x10d4   : > { %2406 = vmatprep.mubr.msk.f32.mxu0 %vm588_vm3, %v1069_v36 }
0x10d7   : > { %2407 = vmatmul.mubr.msk.f32.gmra.mrb[14].mxu0 %vm588_vm3, %v1165_v2 }
0x119a   : > { %v1234_v5 = vpop.f32.mrb[8].mxu0 }
0x119b   : > { %v1238_v14 = vadd.f32 %v1234_v5, %v575_v4  ;;  %v2380_v6 = vpop.f32.mrb[9].mxu0  ;;  %v432_v5 = vld [vmem:[%s3228_s0 + $0x70] sm:$0xff] }
0x119c   : > { %v434_v6 = vld [vmem:[%s3228_s0 + $0x80] sm:$0xff] }
0x119d   : > { %2588 = vtanh.f32 %v1238_v14 }
0x11a2   : > { %v2402_v7 = vpop.f32.mrb[10].mxu0 }
0x11a3   : > { %v1430_v8 = vpop.f32.mrb[11].mxu0  ;;  %v1436_v27 = vadd.f32 %v2402_v7, %v2994_v25  ;;  %v435_v7 = vld [vmem:[%s3228_s0 + $0x88] sm:$0xff] }
0x11a4   : > { %v1431_v26 = vadd.f32 %v2994_v25, %v1430_v8  ;;  %v2524_v8 = vpack.c.bf16 %v435_v7, %v434_v6 }
0x11a6   : > { %v2405_v37 = vpop.f32.mrb[12].mxu0 }
0x11a7   : > { %v2589_v9 = vpop.eup %2588  ;;  %v1440_v10 = vpop.f32.mrb[13].mxu0  ;;  %v1446_v53 = vadd.f32 %v2405_v37, %v2994_v25 }
0x11a8   : > { %v1240_v63 = vmul.f32 %v2589_v9, %v2852_v1  ;;  %v1441_v28 = vadd.f32 %v2994_v25, %v1440_v10  ;;  %v3040_v10 = vld [vmem:[%s3228_s0 + $0x92] ss:$0 sm:$0xff] }
0x11aa   : > { %v2408_v11 = vpop.f32.mrb[14].mxu0  ;;  %v1241_v12 = vadd.f32 %v1240_v63, %v2855_v3 }
0x11ab   : > { %v1450_v13 = vpop.f32.mrb[15].mxu0  ;;  %v1456_v39 = vadd.f32 %v2408_v11, %v2994_v25 }
0x11ac   : > { %1244 = vrot.lane.b32.xlu0 %v1241_v12, %s2656_s23  ;;  %v1242_v58 = vmul.f32 %v1241_v12, %v1156_v48  ;;  %v1451_v33 = vadd.f32 %v2994_v25, %v1450_v13 }
0x121e   : > { %v1245_v15 = vpop.permute.xlu0 %1244 }
0x121f   : > { %v1247_v16 = vmul.f32 %v1245_v15, %v1241_v12 }
0x1221   : > { %1249 = vrot.lane.b32.xlu1 %v1247_v16, %s2656_s23 }
0x1293   : > { %v1250_v17 = vpop.permute.xlu1 %1249 }
0x1294   : > { %v2980_v18 = vadd.f32 %v1250_v17, %v1242_v58 }
0x1296   : > { %2590 = vtanh.f32 %v2980_v18 }
0x1297   : > { %2592 = vtanh.f32 %v1431_v26 }
0x1298   : > { %2594 = vtanh.f32 %v1436_v27 }
0x1299   : > { %2596 = vtanh.f32 %v1441_v28 }
0x129a   : > { %2598 = vtanh.f32 %v1446_v53 }
0x129b   : > { %2600 = vtanh.f32 %v1451_v33 }
0x129c   : > { %2602 = vtanh.f32 %v1456_v39 }
0x12a0   : > { %v2591_v22 = vpop.eup %2590 }
0x12a1   : > { %1255 = vrot.lane.b32.xlu0 %v2591_v22, %s2656_s23  ;;  %v2593_v38 = vpop.eup %2592 }
0x12a2   : > { %v2595_v42 = vpop.eup %2594 }
0x12a3   : > { %v2597_v43 = vpop.eup %2596 }
0x12a4   : > { %v2599_v44 = vpop.eup %2598 }
0x12a5   : > { %v2601_v45 = vpop.eup %2600 }
0x12a6   : > { %v2603_v46 = vpop.eup %2602 }
0x1313   : > { %v1256_v23 = vpop.permute.xlu0 %1255 }
0x1314   : > { %v1258_v24 = vmul.f32 %v1256_v23, %v1241_v12 }
0x1316   : > { %1260 = vrot.lane.b32.xlu1 %v1258_v24, %s2657_s28  ;;  %v3061_v24 = vrot.slane %v2826_v41, %v2830_v47 }
0x1388   : > { %v1261_v36 = vpop.permute.xlu1 %1260 }
0x1389   : > { %2390 = vmatmul.mubr.msk.f32.vlgmr.msra.gmra.mrb[12].mxu1 %vm588_vm3, %v1261_v36  ;;  %2409 = vmatprep.mubr.msk.f32.mxu0 %vm588_vm3, %v1261_v36 }
0x138a   : > { %2515 = vmatpush3.bf16.msra.mxu1 %v2512_v21  ;;  %2420 = vmatprep.mubr.msk.f32.mxu1 %vm588_vm3, %v2593_v38 }
0x138b   : > { %2517 = vmatprep.subr.bf16.mxu1 %v2516_v35 }
0x138e   : > { %2519 = vmatpush3.bf16.msra.mxu1 %v2516_v35 }
0x1391   : > { %2421 = vmatmul.mubr.msk.f32.vlgmr.msra.gmra.mrb[14].mxu1 %vm588_vm3, %v2595_v42 }
0x1392   : > { %2423 = vmatprep.mubr.msk.f32.mxu1 %vm588_vm3, %v2597_v43 }
0x1395   : > { %2424 = vmatmul.mubr.msk.f32.gmra.mrb[16].mxu1 %vm588_vm3, %v2599_v44 }
0x1396   : > { %2426 = vmatprep.mubr.msk.f32.mxu1 %vm588_vm3, %v2601_v45 }
0x1399   : > { %2427 = vmatmul.mubr.msk.f32.gmra.mrb[18].mxu1 %vm588_vm3, %v2603_v46 }
0x145c   : > { %v1330_v30 = vpop.f32.mrb[12].mxu1 }
0x145d   : > { %v1334_v34 = vadd.f32 %v1330_v30, %v580_v32  ;;  %v2391_v40 = vpop.f32.mrb[13].mxu1 }
0x145f   : > { %2604 = vtanh.f32 %v1334_v34 }
0x1464   : > { %v2422_v48 = vpop.f32.mrb[14].mxu1 }
0x1465   : > { %v1571_v52 = vpop.f32.mrb[15].mxu1  ;;  %v1577_v11 = vadd.f32 %v2422_v48, %v3040_v10 }
0x1466   : > { %v1572_v63 = vadd.f32 %v3040_v10, %v1571_v52 }
0x1468   : > { %v2425_v50 = vpop.f32.mrb[16].mxu1 }
0x1469   : > { %v2605_v54 = vpop.eup %2604  ;;  %v1581_v55 = vpop.f32.mrb[17].mxu1  ;;  %v1587_v13 = vadd.f32 %v2425_v50, %v3040_v10 }
0x146a   : > { %v1336_v59 = vmul.f32 %v2605_v54, %v2852_v1  ;;  %v433_v1 = vld [vmem:[%s3228_s0 + $0x78] sm:$0xff]  ;;  %v1582_v12 = vadd.f32 %v3040_v10, %v1581_v55 }
0x146c   : > { %v2428_v60 = vpop.f32.mrb[18].mxu1  ;;  %v1337_v61 = vadd.f32 %v1336_v59, %v2855_v3  ;;  %v2520_v3 = vpack.c.bf16 %v433_v1, %v432_v5 }
0x146d   : > { %v1591_v62 = vpop.f32.mrb[19].mxu1  ;;  %v1597_v16 = vadd.f32 %v2428_v60, %v3040_v10 }
0x146e   : > { %1340 = vrot.lane.b32.xlu0 %v1337_v61, %s2656_s23  ;;  %v1338_v56 = vmul.f32 %v1337_v61, %v2980_v18  ;;  %2521 = vmatprep.subr.bf16.mxu0 %v2520_v3  ;;  %v1592_v15 = vadd.f32 %v3040_v10, %v1591_v62 }
0x146f   : > { %2523 = vmatpush3.bf16.msra.mxu0 %v2520_v3 }
0x1470   : > { %2525 = vmatprep.subr.bf16.mxu0 %v2524_v8 }
0x1473   : > { %2527 = vmatpush3.bf16.msra.mxu0 %v2524_v8  ;;  %v1765_v8 = vld [vmem:[%s3093_s25 + $0x8] sm:$0xff] }
0x14e0   : > { %v1341_v0 = vpop.permute.xlu0 %1340 }
0x14e1   : > { %v1343_v2 = vmul.f32 %v1341_v0, %v1337_v61 }
0x14e3   : > { %1345 = vrot.lane.b32.xlu1 %v1343_v2, %s2656_s23 }
0x1555   : > { %v1346_v57 = vpop.permute.xlu1 %1345 }
0x1556   : > { %v1348_v4 = vadd.f32 %v1346_v57, %v1338_v56 }
0x1558   : > { %2606 = vtanh.f32 %v1348_v4 }
0x1559   : > { %2608 = vtanh.f32 %v1572_v63  ;;  %v1764_v63 = vld [vmem:[%s3093_s25] sm:$0xff] }
0x155a   : > { %2610 = vtanh.f32 %v1577_v11 }
0x155b   : > { %2612 = vtanh.f32 %v1582_v12 }
0x155c   : > { %2614 = vtanh.f32 %v1587_v13 }
0x155d   : > { %2616 = vtanh.f32 %v1592_v15 }
0x155e   : > { %2618 = vtanh.f32 %v1597_v16 }
0x1562   : > { %v2607_v14 = vpop.eup %2606 }
0x1563   : > { %1351 = vrot.lane.b32.xlu0 %v2607_v14, %s2656_s23  ;;  %v2609_v17 = vpop.eup %2608  ;;  %s3056_s23 = scalar_lea.vmem [#allocation3], %s2752_s6  ;;  %v3089_v14 = vld [vmem:[%s3228_s0 + $0x93] ss:$0 sm:$0xff]  ;;  %s2199_s6 = sshll.u32 (%p2717_p5), %s2124_s18, 3 }
0x1564   : > { %v2611_v18 = vpop.eup %2610  ;;  %v1756_v23 = vld [vmem:[%s3056_s23] sm:$0xff]  ;;  %v1757_v26 = vld [vmem:[%s3056_s23 + $0x8] sm:$0xff]  ;;  %v1758_v53 = vld [vmem:[%s3056_s23 + $0x10] sm:$0xff]  ;;  %s1971_s29 = scalar_lea.vmem (%p2717_p5), %s3232_s4, %s2199_s6 }
0x1565   : > { %v2613_v19 = vpop.eup %2612  ;;  %v1792_v27 = vmul.f32 -0.5, %v1756_v23  ;;  %v1793_v28 = vmul.f32 -0.5, %v1757_v26  ;;  %v1759_v35 = vld [vmem:[%s3056_s23 + $0x18] sm:$0xff]  ;;  %v1794_v36 = vmul.f32 -0.5, %v1758_v53  ;;  %v3069_v44 = vld [vmem:[%s3056_s23 + $0x20] sm:$0xff]  ;;  %v1761_v32 = vld [vmem:[%s3056_s23 + $0x28] sm:$0xff]  ;;  %v1777_v6 = vmul.f32 %v2833_v49, %v1757_v26 }
0x1566   : > { %v2615_v20 = vpop.eup %2614  ;;  %v1795_v39 = vmul.f32 -0.5, %v1759_v35  ;;  %v1796_v30 = vmul.f32 -0.5, %v3069_v44  ;;  %v1797_v48 = vmul.f32 -0.5, %v1761_v32  ;;  %v1779_v15 = vmul.f32 %v2833_v49, %v1759_v35 }
0x1567   : > { %v2617_v21 = vpop.eup %2616  ;;  %v1800_v29 = vmul.f32 %v1792_v27, %v1756_v23  ;;  %v1801_v31 = vmul.f32 %v1793_v28, %v1757_v26  ;;  %v1802_v43 = vmul.f32 %v1794_v36, %v1758_v53 }
0x1568   : > { %v2619_v22 = vpop.eup %2618  ;;  %v1803_v47 = vmul.f32 %v1795_v39, %v1759_v35  ;;  %v1804_v50 = vmul.f32 %v1796_v30, %v3069_v44  ;;  %v1805_v55 = vmul.f32 %v1797_v48, %v1761_v32  ;;  %v1769_v39 = vld [vmem:[%s3093_s25 + $0x28] sm:$0xff] }
0x1569   : > { %v1812_v33 = vsub.f32 %v1800_v29, %v3061_v24  ;;  %v1813_v38 = vsub.f32 %v1801_v31, %v3061_v24  ;;  %v1814_v46 = vsub.f32 %v1802_v43, %v3061_v24 }
0x156a   : > { %v1815_v40 = vsub.f32 %v1803_v47, %v3061_v24  ;;  %v1816_v60 = vsub.f32 %v1804_v50, %v3061_v24  ;;  %v1817_v62 = vsub.f32 %v1805_v55, %v3061_v24 }
0x156b   : > { %v2182_v42 = vadd.f32 -0.9189385, %v1812_v33  ;;  %v2183_v41 = vadd.f32 -0.9189385, %v1813_v38  ;;  %v2184_v52 = vadd.f32 -0.9189385, %v1814_v46 }
0x156c   : > { %v2185_v54 = vadd.f32 -0.9189385, %v1815_v40  ;;  %v2186_v0 = vadd.f32 -0.9189385, %v1816_v60  ;;  %v2187_v2 = vadd.f32 -0.9189385, %v1817_v62 }
0x156d   : > { %v1829_v45 = vsel %vm1828_vm4, %v2182_v42, 0.0  ;;  %v1832_v34 = vsel %vm1828_vm4, %v2183_v41, 0.0  ;;  %v1835_v59 = vsel %vm1828_vm4, %v2184_v52, 0.0  ;;  %v1780_v42 = vmul.f32 %v2833_v49, %v3069_v44 }
0x156e   : > { %v1841_v56 = vsel %vm1828_vm4, %v2186_v0, 0.0  ;;  %v1844_v57 = vsel %vm1828_vm4, %v2187_v2, 0.0 }
0x1582   : > { %1833 = vadd.xlane.f32.xlu0 %v1832_v34 }
0x15d5   : > { %v1352_v37 = vpop.permute.xlu0 %1351 }
0x15d6   : > { %v1354_v9 = vmul.f32 %v1352_v37, %v1337_v61  ;;  %v1838_v61 = vsel %vm1828_vm4, %v2185_v54, 0.0  ;;  %v1776_v37 = vmul.f32 %v2833_v49, %v1756_v23  ;;  %v1766_v23 = vld [vmem:[%s3093_s25 + $0x10] sm:$0xff] }
0x15d7   : > { %1839 = vadd.xlane.f32.xlu0 %v1838_v61 }
0x15d8   : > { %1360 = vrot.lane.b32.xlu1 %v1354_v9, %s2657_s28 }
0x15db   : > { %1845 = vadd.xlane.f32.xlu0 %v1844_v57 }
0x15fc   : > { %1830 = vadd.xlane.f32.xlu1 %v1829_v45  ;;  %v1768_v45 = vld [vmem:[%s3093_s25 + $0x20] sm:$0xff] }
0x1600   : > { %1836 = vadd.xlane.f32.xlu1 %v1835_v59 }
0x1604   : > { %1842 = vadd.xlane.f32.xlu1 %v1841_v56 }
0x164a   : > { %v1361_v58 = vpop.permute.xlu1 %1360 }
0x164b   : > { %2410 = vmatmul.mubr.msk.f32.gmra.mrb[16].mxu0 %vm588_vm3, %v1361_v58 }
0x164c   : > { %2440 = vmatprep.mubr.msk.f32.mxu0 %vm588_vm3, %v2609_v17 }
0x164f   : > { %2441 = vmatmul.mubr.msk.f32.vlgmr.msra.gmra.mrb[18].mxu0 %vm588_vm3, %v2611_v18  ;;  %v1767_v18 = vld [vmem:[%s3093_s25 + $0x18] sm:$0xff] }
0x1650   : > { %2443 = vmatprep.mubr.msk.f32.mxu0 %vm588_vm3, %v2613_v19  ;;  %v1778_v19 = vmul.f32 %v2833_v49, %v1758_v53  ;;  %v1781_v53 = vmul.f32 %v2833_v49, %v1761_v32 }
0x1653   : > { %2444 = vmatmul.mubr.msk.f32.gmra.mrb[20].mxu0 %vm588_vm3, %v2615_v20 }
0x1654   : > { %2446 = vmatprep.mubr.msk.f32.mxu0 %vm588_vm3, %v2617_v21 }
0x1657   : > { %2447 = vmatmul.mubr.msk.f32.gmra.mrb[22].mxu0 %vm588_vm3, %v2619_v22 }
0x171e   : > { %v2411_v4 = vpop.f32.mrb[16].mxu0 }
0x171f   : > { %v1466_v5 = vadd.f32 %v2411_v4, %v2994_v25  ;;  %v1460_v1 = vpop.f32.mrb[17].mxu0 }
0x1720   : > { %v1461_v3 = vadd.f32 %v2994_v25, %v1460_v1 }
0x1722   : > { %2620 = vtanh.f32 %v1461_v3  ;;  %v2442_v7 = vpop.f32.mrb[18].mxu0 }
0x1723   : > { %2622 = vtanh.f32 %v1466_v5  ;;  %v1718_v25 = vadd.f32 %v2442_v7, %v3089_v14  ;;  %v1712_v9 = vpop.f32.mrb[19].mxu0 }
0x1724   : > { %v1713_v11 = vadd.f32 %v3089_v14, %v1712_v9 }
0x1725   : > { %v1785_v12 = vadd.f32 %v1777_v6, %v1718_v25  ;;  %v1854_v13 = vsub.f32 %v1765_v8, %v1718_v25 }
0x1726   : > { %v1784_v16 = vadd.f32 %v1776_v37, %v1713_v11  ;;  %v1853_v58 = vsub.f32 %v1764_v63, %v1713_v11  ;;  %v2445_v17 = vpop.f32.mrb[20].mxu0 }
0x1727   : > { %v1866_v20 = vmul.f32 %v2836_v51, %v1854_v13  ;;  %1938 = vst.msk [vmem:[%s2765_s15 + $0x8] sm:$0xff] %vm1828_vm4, %v1785_v12  ;;  %v1728_v21 = vadd.f32 %v2445_v17, %v3089_v14  ;;  %v1722_v22 = vpop.f32.mrb[21].mxu0 }
0x1728   : > { %v1865_v26 = vmul.f32 %v2836_v51, %v1853_v58  ;;  %1937 = vst.msk [vmem:[%s2765_s15] sm:$0xff] %vm1828_vm4, %v1784_v16  ;;  %v1723_v27 = vadd.f32 %v3089_v14, %v1722_v22 }
0x1729   : > { %v1874_v28 = vmul.f32 -0.5, %v1866_v20  ;;  %v1787_v29 = vadd.f32 %v1779_v15, %v1728_v21  ;;  %v1856_v31 = vsub.f32 %v1767_v18, %v1728_v21 }
0x172a   : > { %v1873_v33 = vmul.f32 -0.5, %v1865_v26  ;;  %v1786_v35 = vadd.f32 %v1778_v19, %v1723_v27  ;;  %v1855_v36 = vsub.f32 %v1766_v23, %v1723_v27  ;;  %v2448_v38 = vpop.f32.mrb[22].mxu0  ;;  %v1831_v19 = vpop.xlane.xlu1 %1830 }
0x172b   : > { %v1868_v43 = vmul.f32 %v2836_v51, %v1856_v31  ;;  %1940 = vst.msk [vmem:[%s2765_s15 + $0x18] sm:$0xff] %vm1828_vm4, %v1787_v29  ;;  %v1738_v41 = vadd.f32 %v2448_v38, %v3089_v14  ;;  %v1732_v47 = vpop.f32.mrb[23].mxu0  ;;  %v1882_v46 = vmul.f32 %v1874_v28, %v1866_v20  ;;  %v1834_v20 = vpop.xlane.xlu0 %1833 }
0x172c   : > { %v2621_v30 = vpop.eup %2620  ;;  %v1867_v32 = vmul.f32 %v2836_v51, %v1855_v36  ;;  %1939 = vst.msk [vmem:[%s2765_s15 + $0x10] sm:$0xff] %vm1828_vm4, %v1786_v35  ;;  %v1733_v34 = vadd.f32 %v3089_v14, %v1732_v47  ;;  %v1881_v40 = vmul.f32 %v1873_v33, %v1865_v26  ;;  %v1762_v47 = vld [vmem:[%s3056_s23 + $0x30] sm:$0xff] }
0x172d   : > { %v2623_v48 = vpop.eup %2622  ;;  %v1876_v44 = vmul.f32 -0.5, %v1868_v43  ;;  %v1789_v52 = vadd.f32 %v1781_v53, %v1738_v41  ;;  %v1858_v50 = vsub.f32 %v1769_v39, %v1738_v41  ;;  %2429 = vmatprep.mubr.msk.f32.mxu1 %vm588_vm3, %v2621_v30  ;;  %v1890_v54 = vsub.f32 %v1882_v46, %v3061_v24  ;;  %v1763_v41 = vld [vmem:[%s3056_s23 + $0x38] sm:$0xff] }
0x172e   : > { %v1875_v55 = vmul.f32 -0.5, %v1867_v32  ;;  %v1788_v59 = vadd.f32 %v1780_v42, %v1733_v34  ;;  %v1857_v60 = vsub.f32 %v1768_v45, %v1733_v34  ;;  %2430 = vmatmul.mubr.msk.f32.gmra.mrb[20].mxu1 %vm588_vm3, %v2623_v48  ;;  %v1889_v61 = vsub.f32 %v1881_v40, %v3061_v24  ;;  %v1837_v21 = vpop.xlane.xlu1 %1836  ;;  %v1771_v30 = vld [vmem:[%s3093_s25 + $0x38] sm:$0xff]  ;;  %v1770_v40 = vld [vmem:[%s3093_s25 + $0x30] sm:$0xff] }
0x172f   : > { %v1870_v62 = vmul.f32 %v2836_v51, %v1858_v50  ;;  %1942 = vst.msk [vmem:[%s2765_s15 + $0x28] sm:$0xff] %vm1828_vm4, %v1789_v52  ;;  %v2191_v0 = vadd.f32 -0.9189385, %v1890_v54  ;;  %v1884_v2 = vmul.f32 %v1876_v44, %v1868_v43  ;;  %v1840_v22 = vpop.xlane.xlu0 %1839  ;;  %v1783_v45 = vmul.f32 %v2833_v49, %v1763_v41 }
0x1730   : > { %v1869_v56 = vmul.f32 %v2836_v51, %v1857_v60  ;;  %1941 = vst.msk [vmem:[%s2765_s15 + $0x20] sm:$0xff] %vm1828_vm4, %v1788_v59  ;;  %v2190_v57 = vadd.f32 -0.9189385, %v1889_v61  ;;  %v1883_v4 = vmul.f32 %v1875_v55, %v1867_v32  ;;  %v1782_v32 = vmul.f32 %v2833_v49, %v1762_v47 }
0x1731   : > { %v1878_v5 = vmul.f32 -0.5, %v1870_v62  ;;  %v1908_v1 = vsel %vm1828_vm4, %v2191_v0, 0.0  ;;  %v1892_v3 = vsub.f32 %v1884_v2, %v3061_v24  ;;  %v1799_v48 = vmul.f32 -0.5, %v1763_v41 }
0x1732   : > { %v1877_v6 = vmul.f32 -0.5, %v1869_v56  ;;  %1909 = vadd.xlane.f32.xlu1 %v1908_v1  ;;  %v1905_v7 = vsel %vm1828_vm4, %v2190_v57, 0.0  ;;  %v1891_v8 = vsub.f32 %v1883_v4, %v3061_v24  ;;  %v1843_v23 = vpop.xlane.xlu1 %1842  ;;  %v1798_v52 = vmul.f32 -0.5, %v1762_v47 }
0x1733   : > { %1906 = vadd.xlane.f32.xlu0 %v1905_v7  ;;  %v2193_v37 = vadd.f32 -0.9189385, %v1892_v3  ;;  %v1886_v25 = vmul.f32 %v1878_v5, %v1870_v62  ;;  %v1846_v26 = vpop.xlane.xlu0 %1845  ;;  %v1807_v61 = vmul.f32 %v1799_v48, %v1763_v41 }
0x1734   : > { %v1885_v9 = vmul.f32 %v1877_v6, %v1869_v56  ;;  %v2192_v12 = vadd.f32 -0.9189385, %v1891_v8  ;;  %v1806_v49 = vmul.f32 %v1798_v52, %v1762_v47 }
0x1735   : > { %v1914_v63 = vsel %vm1828_vm4, %v2193_v37, 0.0  ;;  %v1894_v13 = vsub.f32 %v1886_v25, %v3061_v24 }
0x1736   : > { %v1893_v11 = vsub.f32 %v1885_v9, %v3061_v24  ;;  %v1911_v58 = vsel %vm1828_vm4, %v2192_v12, 0.0  ;;  %v1818_v4 = vsub.f32 %v1806_v49, %v3061_v24 }
0x1737   : > { %1915 = vadd.xlane.f32.xlu0 %v1914_v63  ;;  %v2195_v17 = vadd.f32 -0.9189385, %v1894_v13 }
0x1738   : > { %v2194_v15 = vadd.f32 -0.9189385, %v1893_v11  ;;  %v2188_v7 = vadd.f32 -0.9189385, %v1818_v4 }
0x1739   : > { %v1920_v18 = vsel %vm1828_vm4, %v2195_v17, 0.0 }
0x173a   : > { %v1917_v16 = vsel %vm1828_vm4, %v2194_v15, 0.0  ;;  %v1847_v9 = vsel %vm1828_vm4, %v2188_v7, 0.0 }
0x173b   : > { %1918 = vadd.xlane.f32.xlu1 %v1917_v16  ;;  %1912 = vadd.xlane.f32.xlu0 %v1911_v58 }
0x173f   : > { %1921 = vadd.xlane.f32.xlu0 %v1920_v18 }
0x17bf   : > { %v1910_v27 = vpop.xlane.xlu1 %1909 }
0x17c0   : > { %1947 = vst.msk [vmem:[%s2765_s15 + $0x8] sm:$0xff] %vm1945_vm5, %v1910_v27  ;;  %v1907_v28 = vpop.xlane.xlu0 %1906 }
0x17c1   : > { %1956 = vst.msk [vmem:[%s2765_s15 + $0x8] sm:$0xff] %vm1954_vm6, %v1834_v20 }
0x17c2   : > { %1946 = vst.msk [vmem:[%s2765_s15] sm:$0xff] %vm1945_vm5, %v1907_v28 }
0x17c3   : > { %1955 = vst.msk [vmem:[%s2765_s15] sm:$0xff] %vm1954_vm6, %v1831_v19 }
0x17c4   : > { %v1916_v29 = vpop.xlane.xlu0 %1915 }
0x17c5   : > { %1949 = vst.msk [vmem:[%s2765_s15 + $0x18] sm:$0xff] %vm1945_vm5, %v1916_v29 }
0x17c6   : > { %1958 = vst.msk [vmem:[%s2765_s15 + $0x18] sm:$0xff] %vm1954_vm6, %v1840_v22 }
0x17c8   : > { %v1919_v31 = vpop.xlane.xlu1 %1918  ;;  %v1913_v53 = vpop.xlane.xlu0 %1912  ;;  %v2015_v15 = vld [vmem:[%s2765_s15 + $0x8] sm:$0xff] (%p2717_p5) }
0x17c9   : > { %1950 = vst.msk [vmem:[%s2765_s15 + $0x20] sm:$0xff] %vm1945_vm5, %v1919_v31  ;;  %1948 = vst.msk [vmem:[%s2765_s15 + $0x10] sm:$0xff] %vm1945_vm5, %v1913_v53 }
0x17ca   : > { %1959 = vst.msk [vmem:[%s2765_s15 + $0x20] sm:$0xff] %vm1954_vm6, %v1843_v23  ;;  %1957 = vst.msk [vmem:[%s2765_s15 + $0x10] sm:$0xff] %vm1954_vm6, %v1837_v21  ;;  %v2013_v13 = vld [vmem:[%s2765_s15] sm:$0xff] (%p2717_p5) }
0x17cb   : > { %2014 = vst [vmem:[%s1971_s29] sm:$0xff] (%p2717_p5), %v2013_v13  ;;  %2016 = vst [vmem:[%s1971_s29 + $0x10] sm:$0xff] (%p2717_p5), %v2015_v15 }
0x17cc   : > { %v1922_v33 = vpop.xlane.xlu0 %1921 }
0x17cd   : > { %1951 = vst.msk [vmem:[%s2765_s15 + $0x28] sm:$0xff] %vm1945_vm5, %v1922_v33  ;;  %v2019_v58 = vld [vmem:[%s2765_s15 + $0x18] sm:$0xff] (%p2717_p5) }
0x17ce   : > { %1960 = vst.msk [vmem:[%s2765_s15 + $0x28] sm:$0xff] %vm1954_vm6, %v1846_v26  ;;  %2020 = vst [vmem:[%s1971_s29 + $0x30] sm:$0xff] (%p2717_p5), %v2019_v58 }
0x17d1   : > { %v2017_v16 = vld [vmem:[%s2765_s15 + $0x10] sm:$0xff] (%p2717_p5)  ;;  %v2021_v17 = vld [vmem:[%s2765_s15 + $0x20] sm:$0xff] (%p2717_p5) }
0x17d2   : > { %2018 = vst [vmem:[%s1971_s29 + $0x20] sm:$0xff] (%p2717_p5), %v2017_v16  ;;  %2022 = vst [vmem:[%s1971_s29 + $0x40] sm:$0xff] (%p2717_p5), %v2021_v17 }
0x17d5   : > { %v2023_v18 = vld [vmem:[%s2765_s15 + $0x28] sm:$0xff] (%p2717_p5) }
0x17d6   : > { %2024 = vst [vmem:[%s1971_s29 + $0x50] sm:$0xff] (%p2717_p5), %v2023_v18 }
0x1801   : > { %v2431_v35 = vpop.f32.mrb[20].mxu1 }
0x1802   : > { %v1607_v36 = vadd.f32 %v2431_v35, %v3040_v10  ;;  %v1601_v38 = vpop.f32.mrb[21].mxu1 }
0x1803   : > { %v1602_v39 = vadd.f32 %v3040_v10, %v1601_v38 }
0x1805   : > { %2624 = vtanh.f32 %v1602_v39 }
0x1806   : > { %2626 = vtanh.f32 %v1607_v36 }
0x180f   : > { %v2625_v42 = vpop.eup %2624 }
0x1810   : > { %v2627_v43 = vpop.eup %2626  ;;  %2449 = vmatprep.mubr.msk.f32.mxu0 %vm588_vm3, %v2625_v42 }
0x1811   : > { %2450 = vmatmul.mubr.msk.f32.gmra.mrb[24].mxu0 %vm588_vm3, %v2627_v43 }
0x18e4   : > { %v2451_v46 = vpop.f32.mrb[24].mxu0 }
0x18e5   : > { %v1748_v10 = vadd.f32 %v2451_v46, %v3089_v14  ;;  %v1742_v34 = vpop.f32.mrb[25].mxu0 }
0x18e6   : > { %v1743_v44 = vadd.f32 %v3089_v14, %v1742_v34  ;;  %v1819_v14 = vsub.f32 %v1807_v61, %v3061_v24 }
0x18e7   : > { %v1791_v50 = vadd.f32 %v1783_v45, %v1748_v10  ;;  %v1860_v54 = vsub.f32 %v1771_v30, %v1748_v10 }
0x18e8   : > { %v1790_v55 = vadd.f32 %v1782_v32, %v1743_v44  ;;  %v1859_v59 = vsub.f32 %v1770_v40, %v1743_v44  ;;  %v2189_v6 = vadd.f32 -0.9189385, %v1819_v14 }
0x18e9   : > { %v1872_v60 = vmul.f32 %v2836_v51, %v1860_v54  ;;  %1944 = vst.msk [vmem:[%s2765_s15 + $0x38] sm:$0xff] %vm1828_vm4, %v1791_v50 }
0x18ea   : > { %v1871_v62 = vmul.f32 %v2836_v51, %v1859_v59  ;;  %1943 = vst.msk [vmem:[%s2765_s15 + $0x30] sm:$0xff] %vm1828_vm4, %v1790_v55  ;;  %v1850_v25 = vsel %vm1828_vm4, %v2189_v6, 0.0 }
0x18eb   : > { %v1880_v0 = vmul.f32 -0.5, %v1872_v60 }
0x18ec   : > { %v1879_v2 = vmul.f32 -0.5, %v1871_v62 }
0x18ed   : > { %v1888_v56 = vmul.f32 %v1880_v0, %v1872_v60 }
0x18ee   : > { %v1887_v57 = vmul.f32 %v1879_v2, %v1871_v62 }
0x18ef   : > { %v1896_v5 = vsub.f32 %v1888_v56, %v3061_v24 }
0x18f0   : > { %v1895_v1 = vsub.f32 %v1887_v57, %v3061_v24 }
0x18f1   : > { %v2197_v3 = vadd.f32 -0.9189385, %v1896_v5 }
0x18f2   : > { %v2196_v51 = vadd.f32 -0.9189385, %v1895_v1 }
0x18f3   : > { %v1926_v8 = vsel %vm1828_vm4, %v2197_v3, 0.0 }
0x18f4   : > { %1927 = vadd.xlane.f32.xlu0 %v1926_v8  ;;  %v1923_v37 = vsel %vm1828_vm4, %v2196_v51, 0.0 }
0x18f5   : > { %1924 = vadd.xlane.f32.xlu1 %v1923_v37 }
0x18f8   : > { %1851 = vadd.xlane.f32.xlu0 %v1850_v25 }
0x18f9   : > { %1848 = vadd.xlane.f32.xlu1 %v1847_v9 }
0x1981   : > { %v1928_v24 = vpop.xlane.xlu0 %1927  ;;  %1969 = sbr.rel (!%p2717_p5) target bundleno = 6544 (0x1990), region = 154 }
0x1982   : > { %1953 = vst.msk [vmem:[%s2765_s15 + $0x38] sm:$0xff] %vm1945_vm5, %v1928_v24  ;;  %v1925_v63 = vpop.xlane.xlu1 %1924 }
0x1983   : > { %1952 = vst.msk [vmem:[%s2765_s15 + $0x30] sm:$0xff] %vm1945_vm5, %v1925_v63 }
0x1985   : > { %v1852_v11 = vpop.xlane.xlu0 %1851 }
0x1986   : > { %v1849_v12 = vpop.xlane.xlu1 %1848  ;;  %1962 = vst.msk [vmem:[%s2765_s15 + $0x38] sm:$0xff] %vm1954_vm6, %v1852_v11 }
0x1987   : > { %1961 = vst.msk [vmem:[%s2765_s15 + $0x30] sm:$0xff] %vm1954_vm6, %v1849_v12 }
0x198d   : > { %v2027_v20 = vld [vmem:[%s2765_s15 + $0x38] sm:$0xff] }
0x198e   : > { %v2025_v19 = vld [vmem:[%s2765_s15 + $0x30] sm:$0xff]  ;;  %2028 = vst [vmem:[%s1971_s29 + $0x70] sm:$0xff] %v2027_v20 }
0x198f   : > { %2026 = vst [vmem:[%s1971_s29 + $0x60] sm:$0xff] %v2025_v19 }
0x1990 PF: > { %p11_p10 = scmp.ge.s32.totalorder %s2700_s19, 4   ;;  %s3235_s15 = smov %s2646_s16 }
0x1991   : > { %s3236_s16 = smov %s2711_s22  ;;  %s3237_s17 = smov %s2700_s19 }
0x1992   :  { %13 = sbr.rel (!%p11_p10) target bundleno = 2 (0x2), region = 239 }

</bundles_post_ra>
